<compile_context>
chip_gen: v7x
topology: tpu7x:2x2x1
jax: 0.10.0
libtpu: 0.0.40
codegen_flags: <defaults>
</compile_context>

<pallas_src>
import functools

import jax
import jax.numpy as jnp
from jax.experimental import pallas as pl
from jax.experimental.pallas import tpu as pltpu


def _round_up(a, b):
    return ((a + b - 1) // b) * b


# ------------------------------- kernels ------------------------------------

def lin1_kernel(x_ref, w1_ref, b1_ref, wl_ref, wr_ref, h1l_ref, hroot_ref):
    # h1 = relu(x @ W1 + b1); emit h1 @ Wl (bf16) and h1 @ Wr (f32) once so the
    # streaming stage-2 kernel accumulates straight into 32 output lanes and
    # never re-derives lin1 / lin_l / lin_r per k-step.
    h1 = jnp.maximum(
        jnp.dot(x_ref[...], w1_ref[...], preferred_element_type=jnp.float32)
        + b1_ref[...], 0.0)
    h1l_ref[...] = jnp.dot(
        h1, wl_ref[...], preferred_element_type=jnp.float32).astype(jnp.bfloat16)
    hroot_ref[...] = jnp.dot(h1, wr_ref[...], preferred_element_type=jnp.float32)


def sage_kernel(a_ref, h1l_ref, hroot_ref, dinv_ref, bl_ref, w2_ref, b2_ref,
                o_ref, acc_ref):
    k = pl.program_id(1)

    @pl.when(k == 0)
    def _():
        acc_ref[...] = jnp.zeros_like(acc_ref)

    # Dominant, HBM-streaming op: a (tile_m, tile_k) bf16 slab of the raw 0/1
    # adjacency against the VMEM-resident (h1 @ Wl) slab; f32 accumulation in
    # a (tile_m, 32) scratch that lives across the k axis.
    tile_k = a_ref.shape[1]
    start = pl.multiple_of(k * tile_k, tile_k)
    acc_ref[...] += jnp.dot(a_ref[...], h1l_ref[pl.ds(start, tile_k), :],
                            preferred_element_type=jnp.float32)

    @pl.when(k == pl.num_programs(1) - 1)
    def _():
        # Mean normalization (1/deg, f32), SAGE root term, ReLU, lin2 — tiny
        # work executed once per row tile.
        h2 = jnp.maximum(
            dinv_ref[...] * acc_ref[...] + bl_ref[...] + hroot_ref[...], 0.0)
        o_ref[...] = (jnp.dot(h2, w2_ref[...],
                              preferred_element_type=jnp.float32)
                      + b2_ref[...])


# ------------------------------- wrapper ------------------------------------

def net2_forward(x, edge_index, params, *, tile_m=512, tile_k=2048):
    """Forward pass of Net2. x: [N, 16] f32, edge_index: [2, E] int32.

    tile_k must be a multiple of tile_m, both multiples of 128.  The A slab is
    2 * tile_m * tile_k * 2B when double-buffered (4 MiB at the default
    512x2048) — comfortably inside the 32 MiB scoped VMEM budget on every
    generation including v7x (64 MiB physical).  Only go bigger on the
    128 MiB v5e/v6e parts, and raise vmem_limit_bytes accordingly.
    """
    assert tile_k % tile_m == 0 and tile_m % 128 == 0
    w1, b1, wl, bl, wr, w2, b2 = params
    n = x.shape[0]

    # Shrink the k tile for small graphs so we don't over-pad; it stays a
    # multiple of tile_m (and of 128), so one n_pad serves both grid axes.
    tile_k = min(tile_k, _round_up(n, tile_m))
    n_pad = _round_up(n, tile_k)
    grid_m = n_pad // tile_m
    grid_k = n_pad // tile_k

    # --- glue: O(E) scatters + ONE O(N^2) scatter, no extra dense passes ----
    # Raw edge-count adjacency written directly in its storage dtype (small
    # integer counts are exact in bf16); mean normalization moves into the
    # kernel epilogue in f32 instead of a dense divide + cast here.
    src, dst = edge_index[0], edge_index[1]
    ones_e = jnp.ones(src.shape, jnp.bfloat16)
    a = jnp.zeros((n_pad, n_pad), jnp.bfloat16).at[dst, src].add(ones_e)
    deg = jnp.zeros((n_pad,), jnp.float32).at[dst].add(1.0)        # O(E)
    deg_inv = (1.0 / jnp.maximum(deg, 1.0)).reshape(n_pad, 1)
    x_pad = jnp.pad(x.astype(jnp.float32), ((0, n_pad - n), (0, 0)))
    # NOTE: padded rows of h1l/hroot are relu(b1)-derived and nonzero, but
    # padded rows/columns of A are zero and padded output rows are sliced off.

    # --- stage 1: lin1 + fused lin_l / lin_r projections ---------------------
    h1l, hroot = pl.pallas_call(
        lin1_kernel,
        out_shape=(jax.ShapeDtypeStruct((n_pad, 32), jnp.bfloat16),
                   jax.ShapeDtypeStruct((n_pad, 32), jnp.float32)),
        grid_spec=pltpu.PrefetchScalarGridSpec(
            num_scalar_prefetch=0,
            grid=(grid_m,),
            in_specs=[
                pl.BlockSpec((tile_m, 16), lambda i: (i, 0)),   # x rows
                pl.BlockSpec((16, 16), lambda i: (0, 0)),       # W1
                pl.BlockSpec((1, 16), lambda i: (0, 0)),        # b1
                pl.BlockSpec((16, 32), lambda i: (0, 0)),       # Wl
                pl.BlockSpec((16, 32), lambda i: (0, 0)),       # Wr
            ],
            out_specs=(pl.BlockSpec((tile_m, 32), lambda i: (i, 0)),
                       pl.BlockSpec((tile_m, 32), lambda i: (i, 0))),
        ),
        compiler_params=pltpu.CompilerParams(
            dimension_semantics=("parallel",),
            vmem_limit_bytes=32 * 1024 * 1024),
    )(x_pad, w1, b1, wl, wr)

    # --- stage 2: tiled mean aggregation + SAGE epilogue + lin2 --------------
    cost = pl.CostEstimate(
        flops=2 * n_pad * n_pad * 32,
        transcendentals=0,
        bytes_accessed=(n_pad * n_pad * 2            # A (bf16) — dominant
                        + n_pad * 32 * (2 + 4)       # h1@Wl (bf16) + h1@Wr (f32)
                        + n_pad * 4                  # 1/deg
                        + n_pad * 32 * 4))           # output
    out = pl.pallas_call(
        sage_kernel,
        out_shape=jax.ShapeDtypeStruct((n_pad, 32), jnp.float32),
        grid_spec=pltpu.PrefetchScalarGridSpec(
            num_scalar_prefetch=0,
            grid=(grid_m, grid_k),                       # (row tiles, k tiles)
            in_specs=[
                pl.BlockSpec((tile_m, tile_k), lambda i, k: (i, k)),  # A slab
                pl.BlockSpec((n_pad, 32), lambda i, k: (0, 0)),       # h1@Wl (VMEM-resident)
                pl.BlockSpec((tile_m, 32), lambda i, k: (i, 0)),      # h1@Wr roots
                pl.BlockSpec((tile_m, 1), lambda i, k: (i, 0)),       # 1/deg
                pl.BlockSpec((1, 32), lambda i, k: (0, 0)),           # bl
                pl.BlockSpec((32, 32), lambda i, k: (0, 0)),          # W2
                pl.BlockSpec((1, 32), lambda i, k: (0, 0)),           # b2
            ],
            out_specs=pl.BlockSpec((tile_m, 32), lambda i, k: (i, 0)),
            scratch_shapes=[pltpu.VMEM((tile_m, 32), jnp.float32)],   # acc
        ),
        compiler_params=pltpu.CompilerParams(
            # row axis parallel -> v7x megacore splits it (keep grid_m >= 2
            # for big graphs); k axis is the reduction.
            dimension_semantics=("parallel", "arbitrary"),
            vmem_limit_bytes=32 * 1024 * 1024),
        cost_estimate=cost,
    )(a, h1l, hroot, deg_inv, bl, w2, b2)

    return out[:n]


# ------------------------------ reference -----------------------------------

def net2_reference(x, edge_index, params):
    w1, b1, wl, bl, wr, w2, b2 = params
    n = x.shape[0]
    src, dst = edge_index[0], edge_index[1]
    a = jnp.zeros((n, n), jnp.float32).at[dst, src].add(1.0)
    deg = a.sum(axis=1, keepdims=True)
    a = a / jnp.maximum(deg, 1.0)
    h1 = jnp.maximum(x @ w1 + b1, 0.0)
    h2 = jnp.maximum((a @ h1) @ wl + bl + h1 @ wr, 0.0)
    return h2 @ w2 + b2


def init_params(key):
    ks = jax.random.split(key, 7)
    # lin1: Linear(16, 16)                      (weights pre-transposed [in, out])
    w1 = jax.random.normal(ks[0], (16, 16), jnp.float32) * 0.1
    b1 = jax.random.normal(ks[1], (1, 16), jnp.float32) * 0.1
    # SAGEConv(16, 32): lin_l (with bias) on mean-aggregated neighbors, lin_r on root
    wl = jax.random.normal(ks[2], (16, 32), jnp.float32) * 0.1
    bl = jax.random.normal(ks[3], (1, 32), jnp.float32) * 0.1
    wr = jax.random.normal(ks[4], (16, 32), jnp.float32) * 0.1
    # lin2: Linear(32, 32)
    w2 = jax.random.normal(ks[5], (32, 32), jnp.float32) * 0.1
    b2 = jax.random.normal(ks[6], (1, 32), jnp.float32) * 0.1
    return (w1, b1, wl, bl, wr, w2, b2)


if __name__ == "__main__":
    key = jax.random.PRNGKey(0)
    k_x, k_e, k_p = jax.random.split(key, 3)

    num_nodes = 600      # not tile-aligned -> exercises padding
    num_edges = 2048
    x = jax.random.normal(k_x, (num_nodes, 16), jnp.float32)
    edge_index = jax.random.randint(k_e, (2, num_edges), 0, num_nodes,
                                    dtype=jnp.int32)
    params = init_params(k_p)

    # Small tiles for the demo so the (rows, k) grid is genuinely exercised
    # ((6, 3) here, n_pad=768); production defaults are tile_m=512, tile_k=2048.
    fwd = jax.jit(functools.partial(net2_forward, tile_m=128, tile_k=256))
    out = jax.block_until_ready(fwd(x, edge_index, params))
    assert out.shape == (num_nodes, 32)
    assert out.dtype == jnp.float32

    # bf16 adjacency counts are exact; bf16 (h1 @ Wl) is the only meaningful
    # quantization vs the full-f32 reference.
    ref = net2_reference(x, edge_index, params)
    max_err = float(jnp.max(jnp.abs(out - ref)))
    assert max_err < 5e-2, f"max abs err vs f32 reference too large: {max_err}"

    print("KERNEL_OK")
</pallas_src>

<mosaic_0001>
module attributes {stable_mosaic.version = 11 : i64} {
  func.func private @main(%arg0: i32) attributes {dimension_semantics = [#tpu.dimension_semantics<core_parallel>], iteration_bounds = array<i64: 2>, tpu.core_type = #tpu.core_type<sc_scalar_subcore>, window_params = []} {
    return
  }
}

module attributes {stable_mosaic.version = 11 : i64} {
  func.func private @main(%arg0: i32) attributes {dimension_semantics = [#tpu.dimension_semantics<core_parallel>], iteration_bounds = array<i64: 2>, tpu.core_type = #tpu.core_type<sc_scalar_subcore>, window_params = []} {
    return
  }
}

module attributes {stable_mosaic.version = 11 : i64} {
  func.func @lin1_kernel(%arg0: i32, %arg1: memref<128x16xf32, #tpu.memory_space<vmem>>, %arg2: memref<16x16xf32, #tpu.memory_space<vmem>>, %arg3: memref<1x16xf32, #tpu.memory_space<vmem>>, %arg4: memref<16x32xf32, #tpu.memory_space<vmem>>, %arg5: memref<16x32xf32, #tpu.memory_space<vmem>>, %arg6: memref<128x32xbf16, #tpu.memory_space<vmem>>, %arg7: memref<128x32xf32, #tpu.memory_space<vmem>>) attributes {dimension_semantics = [#tpu.dimension_semantics<parallel>], iteration_bounds = array<i64: 6>, scalar_prefetch = 0 : i64, scratch_operands = 0 : i64, tpu.core_type = #tpu.core_type<tc>, window_params = [{transform_indices = @transform_0, window_bounds = array<i64: 128, 16>}, {pipeline_mode = #tpu.pipeline_mode<synchronous>, transform_indices = @transform_1, window_bounds = array<i64: 16, 16>}, {pipeline_mode = #tpu.pipeline_mode<synchronous>, transform_indices = @transform_2, window_bounds = array<i64: 1, 16>}, {pipeline_mode = #tpu.pipeline_mode<synchronous>, transform_indices = @transform_3, window_bounds = array<i64: 16, 32>}, {pipeline_mode = #tpu.pipeline_mode<synchronous>, transform_indices = @transform_4, window_bounds = array<i64: 16, 32>}, {transform_indices = @transform_5, window_bounds = array<i64: 128, 32>}, {transform_indices = @transform_6, window_bounds = array<i64: 128, 32>}]} {
    %c0 = arith.constant 0 : index
    %c0_0 = arith.constant 0 : index
    %0 = vector.load %arg1[%c0, %c0_0] : memref<128x16xf32, #tpu.memory_space<vmem>>, vector<128x16xf32>
    %c0_1 = arith.constant 0 : index
    %c0_2 = arith.constant 0 : index
    %1 = vector.load %arg2[%c0_1, %c0_2] : memref<16x16xf32, #tpu.memory_space<vmem>>, vector<16x16xf32>
    %cst = arith.constant dense<0.000000e+00> : vector<128x16xf32>
    %2 = tpu.matmul %0, %1, %cst {dimension_numbers = #tpu.dot_dimension_numbers<[1], [0], [0], [1], [0, 0, 1, 1], [], []>} : vector<128x16xf32>, vector<16x16xf32>, vector<128x16xf32> -> vector<128x16xf32>
    %c0_3 = arith.constant 0 : index
    %c0_4 = arith.constant 0 : index
    %3 = vector.load %arg3[%c0_3, %c0_4] : memref<1x16xf32, #tpu.memory_space<vmem>>, vector<1x16xf32>
    %4 = vector.broadcast %3 : vector<1x16xf32> to vector<128x16xf32>
    %5 = arith.addf %2, %4 : vector<128x16xf32>
    %cst_5 = arith.constant 0.000000e+00 : f32
    %6 = vector.broadcast %cst_5 : f32 to vector<128x16xf32>
    %7 = arith.maximumf %5, %6 : vector<128x16xf32>
    %c0_6 = arith.constant 0 : index
    %c0_7 = arith.constant 0 : index
    %8 = vector.load %arg4[%c0_6, %c0_7] : memref<16x32xf32, #tpu.memory_space<vmem>>, vector<16x32xf32>
    %cst_8 = arith.constant dense<0.000000e+00> : vector<128x32xf32>
    %9 = tpu.matmul %7, %8, %cst_8 {dimension_numbers = #tpu.dot_dimension_numbers<[1], [0], [0], [1], [0, 0, 1, 1], [], []>} : vector<128x16xf32>, vector<16x32xf32>, vector<128x32xf32> -> vector<128x32xf32>
    %10 = arith.truncf %9 : vector<128x32xf32> to vector<128x32xbf16>
    %c0_9 = arith.constant 0 : index
    %c0_10 = arith.constant 0 : index
    %11 = vector.load %arg6[%c0_9, %c0_10] : memref<128x32xbf16, #tpu.memory_space<vmem>>, vector<128x32xbf16>
    tpu.vector_store %arg6[%c0_9, %c0_10], %10 {strides = array<i32>} : memref<128x32xbf16, #tpu.memory_space<vmem>>, vector<128x32xbf16>,
    %c0_11 = arith.constant 0 : index
    %c0_12 = arith.constant 0 : index
    %12 = vector.load %arg5[%c0_11, %c0_12] : memref<16x32xf32, #tpu.memory_space<vmem>>, vector<16x32xf32>
    %cst_13 = arith.constant dense<0.000000e+00> : vector<128x32xf32>
    %13 = tpu.matmul %7, %12, %cst_13 {dimension_numbers = #tpu.dot_dimension_numbers<[1], [0], [0], [1], [0, 0, 1, 1], [], []>} : vector<128x16xf32>, vector<16x32xf32>, vector<128x32xf32> -> vector<128x32xf32>
    %c0_14 = arith.constant 0 : index
    %c0_15 = arith.constant 0 : index
    %14 = vector.load %arg7[%c0_14, %c0_15] : memref<128x32xf32, #tpu.memory_space<vmem>>, vector<128x32xf32>
    tpu.vector_store %arg7[%c0_14, %c0_15], %13 {strides = array<i32>} : memref<128x32xf32, #tpu.memory_space<vmem>>, vector<128x32xf32>,
    return
  }
  func.func @transform_0(%arg0: i32) -> (i32, i32) {
    %c0_i32 = arith.constant 0 : i32
    %c0_i32_0 = arith.constant 0 : i32
    return %arg0, %c0_i32 : i32, i32
  }
  func.func @transform_1(%arg0: i32) -> (i32, i32) {
    %c0_i32 = arith.constant 0 : i32
    %c0_i32_0 = arith.constant 0 : i32
    %c0_i32_1 = arith.constant 0 : i32
    return %c0_i32, %c0_i32_0 : i32, i32
  }
  func.func @transform_2(%arg0: i32) -> (i32, i32) {
    %c0_i32 = arith.constant 0 : i32
    %c0_i32_0 = arith.constant 0 : i32
    %c0_i32_1 = arith.constant 0 : i32
    return %c0_i32, %c0_i32_0 : i32, i32
  }
  func.func @transform_3(%arg0: i32) -> (i32, i32) {
    %c0_i32 = arith.constant 0 : i32
    %c0_i32_0 = arith.constant 0 : i32
    %c0_i32_1 = arith.constant 0 : i32
    return %c0_i32, %c0_i32_0 : i32, i32
  }
  func.func @transform_4(%arg0: i32) -> (i32, i32) {
    %c0_i32 = arith.constant 0 : i32
    %c0_i32_0 = arith.constant 0 : i32
    %c0_i32_1 = arith.constant 0 : i32
    return %c0_i32, %c0_i32_0 : i32, i32
  }
  func.func @transform_5(%arg0: i32) -> (i32, i32) {
    %c0_i32 = arith.constant 0 : i32
    %c0_i32_0 = arith.constant 0 : i32
    return %arg0, %c0_i32 : i32, i32
  }
  func.func @transform_6(%arg0: i32) -> (i32, i32) {
    %c0_i32 = arith.constant 0 : i32
    %c0_i32_0 = arith.constant 0 : i32
    return %arg0, %c0_i32 : i32, i32
  }
}

module attributes {stable_mosaic.version = 11 : i64} {
  func.func @sage_kernel(%arg0: i32, %arg1: i32, %arg2: memref<128x256xbf16, #tpu.memory_space<vmem>>, %arg3: memref<768x32xbf16, #tpu.memory_space<vmem>>, %arg4: memref<128x32xf32, #tpu.memory_space<vmem>>, %arg5: memref<128x1xf32, #tpu.memory_space<vmem>>, %arg6: memref<1x32xf32, #tpu.memory_space<vmem>>, %arg7: memref<32x32xf32, #tpu.memory_space<vmem>>, %arg8: memref<1x32xf32, #tpu.memory_space<vmem>>, %arg9: memref<128x32xf32, #tpu.memory_space<vmem>>, %arg10: memref<128x32xf32, #tpu.memory_space<vmem>>) attributes {dimension_semantics = [#tpu.dimension_semantics<parallel>, #tpu.dimension_semantics<arbitrary>], iteration_bounds = array<i64: 6, 3>, scalar_prefetch = 0 : i64, scratch_operands = 1 : i64, tpu.core_type = #tpu.core_type<tc>, window_params = [{transform_indices = @transform_0, window_bounds = array<i64: 128, 256>}, {pipeline_mode = #tpu.pipeline_mode<synchronous>, transform_indices = @transform_1, window_bounds = array<i64: 768, 32>}, {transform_indices = @transform_2, window_bounds = array<i64: 128, 32>}, {transform_indices = @transform_3, window_bounds = array<i64: 128, 1>}, {pipeline_mode = #tpu.pipeline_mode<synchronous>, transform_indices = @transform_4, window_bounds = array<i64: 1, 32>}, {pipeline_mode = #tpu.pipeline_mode<synchronous>, transform_indices = @transform_5, window_bounds = array<i64: 32, 32>}, {pipeline_mode = #tpu.pipeline_mode<synchronous>, transform_indices = @transform_6, window_bounds = array<i64: 1, 32>}, {transform_indices = @transform_7, window_bounds = array<i64: 128, 32>}]} {
    %c0_i32 = arith.constant 0 : i32
    %0 = arith.cmpi eq, %arg1, %c0_i32 : i32
    %1 = arith.extui %0 : i1 to i32
    %c0_i32_0 = arith.constant 0 : i32
    %2 = arith.cmpi ne, %1, %c0_i32_0 : i32
    scf.if %2 {
      %cst_8 = arith.constant 0.000000e+00 : f32
      %15 = vector.broadcast %cst_8 : f32 to vector<128x32xf32>
      %c0_9 = arith.constant 0 : index
      %c0_10 = arith.constant 0 : index
      %16 = vector.load %arg10[%c0_9, %c0_10] : memref<128x32xf32, #tpu.memory_space<vmem>>, vector<128x32xf32>
      tpu.vector_store %arg10[%c0_9, %c0_10], %15 {strides = array<i32>} : memref<128x32xf32, #tpu.memory_space<vmem>>, vector<128x32xf32>,
    } else {
    }
    %c256_i32 = arith.constant 256 : i32
    %3 = arith.muli %arg1, %c256_i32 : i32
    %4 = tpu.assume_multiple %3, 256 : i32
    %c0 = arith.constant 0 : index
    %c0_1 = arith.constant 0 : index
    %5 = vector.load %arg10[%c0, %c0_1] : memref<128x32xf32, #tpu.memory_space<vmem>>, vector<128x32xf32>
    %c0_2 = arith.constant 0 : index
    %c0_3 = arith.constant 0 : index
    %6 = vector.load %arg2[%c0_2, %c0_3] : memref<128x256xbf16, #tpu.memory_space<vmem>>, vector<128x256xbf16>
    %7 = arith.index_cast %4 : i32 to index
    %c0_4 = arith.constant 0 : index
    %8 = vector.load %arg3[%7, %c0_4] : memref<768x32xbf16, #tpu.memory_space<vmem>>, vector<256x32xbf16>
    %cst = arith.constant dense<0.000000e+00> : vector<128x32xf32>
    %9 = tpu.matmul %6, %8, %cst {dimension_numbers = #tpu.dot_dimension_numbers<[1], [0], [0], [1], [0, 0, 1, 1], [], []>} : vector<128x256xbf16>, vector<256x32xbf16>, vector<128x32xf32> -> vector<128x32xf32>
    %10 = arith.addf %5, %9 : vector<128x32xf32>
    %c0_5 = arith.constant 0 : index
    %c0_6 = arith.constant 0 : index
    %11 = vector.load %arg10[%c0_5, %c0_6] : memref<128x32xf32, #tpu.memory_space<vmem>>, vector<128x32xf32>
    tpu.vector_store %arg10[%c0_5, %c0_6], %10 {strides = array<i32>} : memref<128x32xf32, #tpu.memory_space<vmem>>, vector<128x32xf32>,
    %c2_i32 = arith.constant 2 : i32
    %12 = arith.cmpi eq, %arg1, %c2_i32 : i32
    %13 = arith.extui %12 : i1 to i32
    %c0_i32_7 = arith.constant 0 : i32
    %14 = arith.cmpi ne, %13, %c0_i32_7 : i32
    scf.if %14 {
      %c0_8 = arith.constant 0 : index
      %c0_9 = arith.constant 0 : index
      %15 = vector.load %arg5[%c0_8, %c0_9] : memref<128x1xf32, #tpu.memory_space<vmem>>, vector<128x1xf32>
      %c0_10 = arith.constant 0 : index
      %c0_11 = arith.constant 0 : index
      %16 = vector.load %arg10[%c0_10, %c0_11] : memref<128x32xf32, #tpu.memory_space<vmem>>, vector<128x32xf32>
      %17 = vector.broadcast %15 : vector<128x1xf32> to vector<128x32xf32>
      %18 = arith.mulf %17, %16 : vector<128x32xf32>
      %c0_12 = arith.constant 0 : index
      %c0_13 = arith.constant 0 : index
      %19 = vector.load %arg6[%c0_12, %c0_13] : memref<1x32xf32, #tpu.memory_space<vmem>>, vector<1x32xf32>
      %20 = vector.broadcast %19 : vector<1x32xf32> to vector<128x32xf32>
      %21 = arith.addf %18, %20 : vector<128x32xf32>
      %c0_14 = arith.constant 0 : index
      %c0_15 = arith.constant 0 : index
      %22 = vector.load %arg4[%c0_14, %c0_15] : memref<128x32xf32, #tpu.memory_space<vmem>>, vector<128x32xf32>
      %23 = arith.addf %21, %22 : vector<128x32xf32>
      %cst_16 = arith.constant 0.000000e+00 : f32
      %24 = vector.broadcast %cst_16 : f32 to vector<128x32xf32>
      %25 = arith.maximumf %23, %24 : vector<128x32xf32>
      %c0_17 = arith.constant 0 : index
      %c0_18 = arith.constant 0 : index
      %26 = vector.load %arg7[%c0_17, %c0_18] : memref<32x32xf32, #tpu.memory_space<vmem>>, vector<32x32xf32>
      %cst_19 = arith.constant dense<0.000000e+00> : vector<128x32xf32>
      %27 = tpu.matmul %25, %26, %cst_19 {dimension_numbers = #tpu.dot_dimension_numbers<[1], [0], [0], [1], [0, 0, 1, 1], [], []>} : vector<128x32xf32>, vector<32x32xf32>, vector<128x32xf32> -> vector<128x32xf32>
      %c0_20 = arith.constant 0 : index
      %c0_21 = arith.constant 0 : index
      %28 = vector.load %arg8[%c0_20, %c0_21] : memref<1x32xf32, #tpu.memory_space<vmem>>, vector<1x32xf32>
      %29 = vector.broadcast %28 : vector<1x32xf32> to vector<128x32xf32>
      %30 = arith.addf %27, %29 : vector<128x32xf32>
      %c0_22 = arith.constant 0 : index
      %c0_23 = arith.constant 0 : index
      %31 = vector.load %arg9[%c0_22, %c0_23] : memref<128x32xf32, #tpu.memory_space<vmem>>, vector<128x32xf32>
      tpu.vector_store %arg9[%c0_22, %c0_23], %30 {strides = array<i32>} : memref<128x32xf32, #tpu.memory_space<vmem>>, vector<128x32xf32>,
    } else {
    }
    return
  }
  func.func @transform_0(%arg0: i32, %arg1: i32) -> (i32, i32) {
    %c0_i32 = arith.constant 0 : i32
    return %arg0, %arg1 : i32, i32
  }
  func.func @transform_1(%arg0: i32, %arg1: i32) -> (i32, i32) {
    %c0_i32 = arith.constant 0 : i32
    %c0_i32_0 = arith.constant 0 : i32
    %c0_i32_1 = arith.constant 0 : i32
    return %c0_i32, %c0_i32_0 : i32, i32
  }
  func.func @transform_2(%arg0: i32, %arg1: i32) -> (i32, i32) {
    %c0_i32 = arith.constant 0 : i32
    %c0_i32_0 = arith.constant 0 : i32
    return %arg0, %c0_i32 : i32, i32
  }
  func.func @transform_3(%arg0: i32, %arg1: i32) -> (i32, i32) {
    %c0_i32 = arith.constant 0 : i32
    %c0_i32_0 = arith.constant 0 : i32
    return %arg0, %c0_i32 : i32, i32
  }
  func.func @transform_4(%arg0: i32, %arg1: i32) -> (i32, i32) {
    %c0_i32 = arith.constant 0 : i32
    %c0_i32_0 = arith.constant 0 : i32
    %c0_i32_1 = arith.constant 0 : i32
    return %c0_i32, %c0_i32_0 : i32, i32
  }
  func.func @transform_5(%arg0: i32, %arg1: i32) -> (i32, i32) {
    %c0_i32 = arith.constant 0 : i32
    %c0_i32_0 = arith.constant 0 : i32
    %c0_i32_1 = arith.constant 0 : i32
    return %c0_i32, %c0_i32_0 : i32, i32
  }
  func.func @transform_6(%arg0: i32, %arg1: i32) -> (i32, i32) {
    %c0_i32 = arith.constant 0 : i32
    %c0_i32_0 = arith.constant 0 : i32
    %c0_i32_1 = arith.constant 0 : i32
    return %c0_i32, %c0_i32_0 : i32, i32
  }
  func.func @transform_7(%arg0: i32, %arg1: i32) -> (i32, i32) {
    %c0_i32 = arith.constant 0 : i32
    %c0_i32_0 = arith.constant 0 : i32
    return %arg0, %c0_i32 : i32, i32
  }
}

</mosaic_0001>

<bundles_post_ra>
// kernel: net2_forward.2
= control target key start
LH: loop header
LB: loop body
LE: loop exit
PB: predicated region body
PF: predicated region fallthrough
CT: control target
= control target key end

     0   :  { %s1331_s21 = smov 0   ;;  %s1532_s0 = inlined_call_operand.vmem [shape: f32[768,16], index: 0, kind: input, shape index: {}]   ;;  %s1533_s1 = inlined_call_operand.vmem [shape: f32[16,16], index: 1, kind: input, shape index: {}]   ;;  %s1534_s2 = inlined_call_operand.vmem [shape: f32[1,16], index: 2, kind: input, shape index: {}]   ;;  %s1535_s3 = inlined_call_operand.vmem [shape: f32[16,32], index: 3, kind: input, shape index: {}]   ;;  %s1536_s4 = inlined_call_operand.vmem [shape: f32[16,32], index: 4, kind: input, shape index: {}]   ;;  %s1537_s5 = inlined_call_operand.vmem [shape: bf16[768,32], index: 5, kind: output, shape index: {0}]   ;;  %s1538_s6 = inlined_call_operand.vmem [shape: f32[768,32], index: 6, kind: output, shape index: {1}]  }
   0x1 LB: > { %s1034_s22 = sadd.s32 4294967295, %s1294_s21   ;;  %p1038_p0 = scmp.ge.s32.totalorder %s1294_s21, 1  ;;  %s1294_s21 = sphi %s1331_s21, %s17_s21  }
   0x2   : > { %p216_p1 = scmp.lt.s32.totalorder %s1294_s21, 7 }
   0x4   : > { %p217_p2 = pnand %p1038_p0, %p216_p1 }
   0x5   : > { %v285_v0 = vld [vmem:[%s1533_s1] sm:$0xff] (!%p217_p2)  ;;  %v286_v1 = vld [vmem:[%s1533_s1 + $0x8] sm:$0xff] (!%p217_p2)  ;;  %s1039_s27 = sshll.u32 (!%p217_p2), %s1034_s22, 4  ;;  %vm294_vm0 = vcmask (!%p217_p2), 130048   ;;  %vm927_vm1 = vcmask (!%p217_p2), 261120   ;;  %vm763_vm2 = vcmask (!%p217_p2), 257024  }
   0x6   : > { %220 = sbr.rel (%p217_p2) target bundleno = 480 (0x1e0), region = 40  ;;  %v504_v2 = vld [vmem:[%s1535_s3] sm:$0xff] (!%p217_p2)  ;;  %v1266_v3 = vpack.c.bf16 (!%p217_p2), %v286_v1, %v285_v0  ;;  %p252_p3 = scmp.lt.s32.totalorder (!%p217_p2), %s1039_s27, 95  ;;  %v505_v4 = vld [vmem:[%s1535_s3 + $0x8] sm:$0xff] (!%p217_p2) }
   0x7   : > { %v780_v5 = vld [vmem:[%s1536_s4] sm:$0xff] (!%p217_p2)  ;;  %v781_v6 = vld [vmem:[%s1536_s4 + $0x8] sm:$0xff] (!%p217_p2)  ;;  %v1270_v7 = vpack.c.bf16 (!%p217_p2), %v505_v4, %v504_v2 }
   0x8   : > { %v1274_v8 = vpack.c.bf16 (!%p217_p2), %v781_v6, %v780_v5  ;;  %1267 = vmatprep.subr.bf16.mxu0 (!%p217_p2), %v1266_v3  ;;  %1278 = vmatprep.subr.bf16.mxu1 (!%p217_p2), %v1266_v3  ;;  %v1402_v25 = vld [vmem:[%s1534_s2] ss:$0 sm:$0xff] (!%p217_p2) }
   0x9   : > { %1269 = vmatpush3.bf16.msra.mxu0 (!%p217_p2), %v1266_v3  ;;  %1279 = vmatpush3.bf16.msra.mxu1 (!%p217_p2), %v1266_v3 }
   0xa   : > { %1271 = vmatprep.subr.bf16.mxu1 (!%p217_p2), %v1270_v7  ;;  %1275 = vmatprep.subr.bf16.mxu0 (!%p217_p2), %v1274_v8 }
   0xd   : > { %s1540_s27 = smov (!%p252_p3, %s1039_s27), 95 }
   0xe   : > { %s1040_s12 = sshll.u32 %s1540_s27, 3  ;;  %s1042_s18 = sshll.u32 %s1540_s27, 2 }
   0xf   : > { %s1365_s15 = scalar_lea.vmem %s1532_s0, %s1040_s12  ;;  %s1458_s22 = scalar_lea.vmem %s1538_s6, %s1040_s12 }
  0x10   : > { %v269_v9 = vld [vmem:[%s1365_s15] sm:$0xff]  ;;  %v270_v10 = vld [vmem:[%s1365_s15 + $0x8] sm:$0xff]  ;;  %v271_v11 = vld [vmem:[%s1365_s15 + $0x10] sm:$0xff]  ;;  %s1463_s25 = scalar_lea.vmem %s1537_s5, %s1042_s18 }
  0x11   : > { %1186 = vmatprep.mubr.msk.f32.mxu0 %vm294_vm0, %v269_v9  ;;  %v277_v12 = vld [vmem:[%s1365_s15 + $0x40] sm:$0xff]  ;;  %v272_v13 = vld [vmem:[%s1365_s15 + $0x18] sm:$0xff]  ;;  %v278_v14 = vld [vmem:[%s1365_s15 + $0x48] sm:$0xff] }
  0x12   : > { %1187 = vmatmul.mubr.msk.f32.vlgmr.msra.gmra.mrb[0].mxu0 %vm294_vm0, %v270_v10  ;;  %1198 = vmatprep.mubr.msk.f32.mxu1 %vm294_vm0, %v277_v12  ;;  %v279_v15 = vld [vmem:[%s1365_s15 + $0x50] sm:$0xff]  ;;  %v273_v16 = vld [vmem:[%s1365_s15 + $0x20] sm:$0xff]  ;;  %v280_v17 = vld [vmem:[%s1365_s15 + $0x58] sm:$0xff] }
  0x13   : > { %1189 = vmatprep.mubr.msk.f32.mxu0 %vm294_vm0, %v271_v11  ;;  %1199 = vmatmul.mubr.msk.f32.vlgmr.msra.gmra.mrb[0].mxu1 %vm294_vm0, %v278_v14  ;;  %v281_v18 = vld [vmem:[%s1365_s15 + $0x60] sm:$0xff]  ;;  %v274_v19 = vld [vmem:[%s1365_s15 + $0x28] sm:$0xff]  ;;  %v275_v20 = vld [vmem:[%s1365_s15 + $0x30] sm:$0xff] }
  0x14   : > { %1277 = vmatpush3.bf16.msra.mxu0 %v1274_v8  ;;  %1201 = vmatprep.mubr.msk.f32.mxu1 %vm294_vm0, %v279_v15  ;;  %v282_v21 = vld [vmem:[%s1365_s15 + $0x68] sm:$0xff]  ;;  %v283_v22 = vld [vmem:[%s1365_s15 + $0x70] sm:$0xff]  ;;  %v276_v23 = vld [vmem:[%s1365_s15 + $0x38] sm:$0xff] }
  0x15   : > { %1273 = vmatpush3.bf16.msra.mxu1 %v1270_v7  ;;  %v284_v24 = vld [vmem:[%s1365_s15 + $0x78] sm:$0xff] }
  0x16   : > { %1190 = vmatmul.mubr.msk.f32.gmra.mrb[2].mxu0 %vm294_vm0, %v272_v13 }
  0x17   : > { %1192 = vmatprep.mubr.msk.f32.mxu0 %vm294_vm0, %v273_v16  ;;  %1202 = vmatmul.mubr.msk.f32.gmra.mrb[2].mxu1 %vm294_vm0, %v280_v17 }
  0x18   : > { %1204 = vmatprep.mubr.msk.f32.mxu1 %vm294_vm0, %v281_v18 }
  0x1a   : > { %1193 = vmatmul.mubr.msk.f32.gmra.mrb[4].mxu0 %vm294_vm0, %v274_v19 }
  0x1b   : > { %1195 = vmatprep.mubr.msk.f32.mxu0 %vm294_vm0, %v275_v20  ;;  %1205 = vmatmul.mubr.msk.f32.gmra.mrb[4].mxu1 %vm294_vm0, %v282_v21 }
  0x1c   : > { %1207 = vmatprep.mubr.msk.f32.mxu1 %vm294_vm0, %v283_v22 }
  0x1e   : > { %1196 = vmatmul.mubr.msk.f32.gmra.mrb[6].mxu0 %vm294_vm0, %v276_v23 }
  0x1f   : > { %1208 = vmatmul.mubr.msk.f32.gmra.mrb[6].mxu1 %vm294_vm0, %v284_v24 }
  0xe5   : > { %v1188_v26 = vpop.f32.mrb[0].mxu0 }
  0xe6   : > { %v415_v27 = vadd.f32 %v1188_v26, %v1402_v25  ;;  %v409_v28 = vpop.f32.mrb[1].mxu0  ;;  %v1200_v30 = vpop.f32.mrb[0].mxu1 }
  0xe7   : > { %v410_v29 = vadd.f32 %v1402_v25, %v409_v28  ;;  %v449_v31 = vpop.f32.mrb[1].mxu1  ;;  %v455_v61 = vadd.f32 %v1200_v30, %v1402_v25 }
  0xe8   : > { %v489_v34 = vmax.f32 %v415_v27, 0.0  ;;  %v450_v50 = vadd.f32 %v1402_v25, %v449_v31 }
  0xe9   : > { %v488_v32 = vmax.f32 %v410_v29, 0.0  ;;  %v1191_v33 = vpop.f32.mrb[2].mxu0  ;;  %v497_v0 = vmax.f32 %v455_v61, 0.0 }
  0xea   : > { %v425_v35 = vadd.f32 %v1191_v33, %v1402_v25  ;;  %v419_v36 = vpop.f32.mrb[3].mxu0  ;;  %v1203_v38 = vpop.f32.mrb[2].mxu1  ;;  %v496_v58 = vmax.f32 %v450_v50, 0.0 }
  0xeb   : > { %v420_v37 = vadd.f32 %v1402_v25, %v419_v36  ;;  %1214 = vmatprep.mubr.msk.f32.mxu1 %vm294_vm0, %v488_v32  ;;  %1242 = vmatprep.mubr.msk.f32.mxu0 %vm294_vm0, %v488_v32  ;;  %v459_v39 = vpop.f32.mrb[3].mxu1  ;;  %v465_v1 = vadd.f32 %v1203_v38, %v1402_v25 }
  0xec   : > { %1215 = vmatmul.mubr.msk.f32.vlgmr.msra.gmra.mrb[8].mxu1 %vm294_vm0, %v489_v34  ;;  %1243 = vmatmul.mubr.msk.f32.vlgmr.msra.gmra.mrb[8].mxu0 %vm294_vm0, %v489_v34  ;;  %v491_v42 = vmax.f32 %v425_v35, 0.0  ;;  %v460_v59 = vadd.f32 %v1402_v25, %v459_v39 }
  0xed   : > { %v490_v40 = vmax.f32 %v420_v37, 0.0  ;;  %v1194_v41 = vpop.f32.mrb[4].mxu0  ;;  %v499_v4 = vmax.f32 %v465_v1, 0.0 }
  0xee   : > { %v435_v43 = vadd.f32 %v1194_v41, %v1402_v25  ;;  %v429_v44 = vpop.f32.mrb[5].mxu0  ;;  %v1206_v46 = vpop.f32.mrb[4].mxu1  ;;  %v498_v62 = vmax.f32 %v460_v59, 0.0 }
  0xef   : > { %v430_v45 = vadd.f32 %v1402_v25, %v429_v44  ;;  %1217 = vmatprep.mubr.msk.f32.mxu1 %vm294_vm0, %v490_v40  ;;  %1245 = vmatprep.mubr.msk.f32.mxu0 %vm294_vm0, %v490_v40  ;;  %v469_v47 = vpop.f32.mrb[5].mxu1  ;;  %v475_v5 = vadd.f32 %v1206_v46, %v1402_v25 }
  0xf0   : > { %1218 = vmatmul.mubr.msk.f32.gmra.mrb[10].mxu1 %vm294_vm0, %v491_v42  ;;  %1246 = vmatmul.mubr.msk.f32.gmra.mrb[10].mxu0 %vm294_vm0, %v491_v42  ;;  %v493_v51 = vmax.f32 %v435_v43, 0.0  ;;  %v470_v63 = vadd.f32 %v1402_v25, %v469_v47 }
  0xf1   : > { %v492_v48 = vmax.f32 %v430_v45, 0.0  ;;  %v1197_v49 = vpop.f32.mrb[6].mxu0  ;;  %v501_v7 = vmax.f32 %v475_v5, 0.0 }
  0xf2   : > { %v445_v52 = vadd.f32 %v1197_v49, %v1402_v25  ;;  %v439_v53 = vpop.f32.mrb[7].mxu0  ;;  %v1209_v55 = vpop.f32.mrb[6].mxu1  ;;  %v500_v2 = vmax.f32 %v470_v63, 0.0 }
  0xf3   : > { %v440_v54 = vadd.f32 %v1402_v25, %v439_v53  ;;  %1220 = vmatprep.mubr.msk.f32.mxu1 %vm294_vm0, %v492_v48  ;;  %1248 = vmatprep.mubr.msk.f32.mxu0 %vm294_vm0, %v492_v48  ;;  %v479_v56 = vpop.f32.mrb[7].mxu1  ;;  %v485_v8 = vadd.f32 %v1209_v55, %v1402_v25 }
  0xf4   : > { %1221 = vmatmul.mubr.msk.f32.gmra.mrb[12].mxu1 %vm294_vm0, %v493_v51  ;;  %1249 = vmatmul.mubr.msk.f32.gmra.mrb[12].mxu0 %vm294_vm0, %v493_v51  ;;  %v495_v60 = vmax.f32 %v445_v52, 0.0  ;;  %v480_v3 = vadd.f32 %v1402_v25, %v479_v56 }
  0xf5   : > { %v494_v57 = vmax.f32 %v440_v54, 0.0  ;;  %v503_v9 = vmax.f32 %v485_v8, 0.0 }
  0xf6   : > { %v502_v6 = vmax.f32 %v480_v3, 0.0 }
  0xf7   : > { %1223 = vmatprep.mubr.msk.f32.mxu1 %vm294_vm0, %v494_v57  ;;  %1251 = vmatprep.mubr.msk.f32.mxu0 %vm294_vm0, %v494_v57 }
  0xf8   : > { %1224 = vmatmul.mubr.msk.f32.gmra.mrb[14].mxu1 %vm294_vm0, %v495_v60  ;;  %1252 = vmatmul.mubr.msk.f32.gmra.mrb[14].mxu0 %vm294_vm0, %v495_v60 }
  0xf9   : > { %1226 = vmatprep.mubr.msk.f32.mxu1 %vm294_vm0, %v496_v58  ;;  %1254 = vmatprep.mubr.msk.f32.mxu0 %vm294_vm0, %v496_v58 }
  0xfc   : > { %1227 = vmatmul.mubr.msk.f32.gmra.mrb[16].mxu1 %vm294_vm0, %v497_v0  ;;  %1255 = vmatmul.mubr.msk.f32.gmra.mrb[16].mxu0 %vm294_vm0, %v497_v0 }
  0xfd   : > { %1229 = vmatprep.mubr.msk.f32.mxu1 %vm294_vm0, %v498_v62  ;;  %1257 = vmatprep.mubr.msk.f32.mxu0 %vm294_vm0, %v498_v62 }
 0x100   : > { %1230 = vmatmul.mubr.msk.f32.gmra.mrb[18].mxu1 %vm294_vm0, %v499_v4  ;;  %1258 = vmatmul.mubr.msk.f32.gmra.mrb[18].mxu0 %vm294_vm0, %v499_v4 }
 0x101   : > { %1232 = vmatprep.mubr.msk.f32.mxu1 %vm294_vm0, %v500_v2  ;;  %1260 = vmatprep.mubr.msk.f32.mxu0 %vm294_vm0, %v500_v2 }
 0x104   : > { %1233 = vmatmul.mubr.msk.f32.gmra.mrb[20].mxu1 %vm294_vm0, %v501_v7  ;;  %1261 = vmatmul.mubr.msk.f32.gmra.mrb[20].mxu0 %vm294_vm0, %v501_v7 }
 0x105   : > { %1235 = vmatprep.mubr.msk.f32.mxu1 %vm294_vm0, %v502_v6  ;;  %1263 = vmatprep.mubr.msk.f32.mxu0 %vm294_vm0, %v502_v6 }
 0x108   : > { %1236 = vmatmul.mubr.msk.f32.gmra.mrb[22].mxu1 %vm294_vm0, %v503_v9  ;;  %1264 = vmatmul.mubr.msk.f32.gmra.mrb[22].mxu0 %vm294_vm0, %v503_v9 }
 0x1bf   : > { %v1216_v10 = vpop.f32.mrb[8].mxu1  ;;  %v1244_v11 = vpop.f32.mrb[8].mxu0 }
 0x1c0   : > { %v1113_v12 = vpack.c.bf16 %v1216_v10, %v1216_v10  ;;  %929 = vst.msk [vmem:[%s1458_s22 + $0x8] sm:$0xff] %vm927_vm1, %v1244_v11  ;;  %v620_v13 = vpop.f32.mrb[9].mxu1  ;;  %v848_v14 = vpop.f32.mrb[9].mxu0 }
 0x1c1   : > { %v1112_v15 = vpack.c.bf16 %v620_v13, %v620_v13  ;;  %928 = vst.msk [vmem:[%s1458_s22] sm:$0xff] %vm927_vm1, %v848_v14 }
 0x1c2   : > { %765 = vst.msk [vmem:[%s1463_s25 + $0x4] sm:$0xf] %vm763_vm2, %v1113_v12 }
 0x1c3   : > { %764 = vst.msk [vmem:[%s1463_s25] sm:$0xf] %vm763_vm2, %v1112_v15  ;;  %v1219_v16 = vpop.f32.mrb[10].mxu1  ;;  %v1247_v17 = vpop.f32.mrb[10].mxu0 }
 0x1c4   : > { %v1115_v18 = vpack.c.bf16 %v1219_v16, %v1219_v16  ;;  %931 = vst.msk [vmem:[%s1458_s22 + $0x18] sm:$0xff] %vm927_vm1, %v1247_v17  ;;  %v630_v19 = vpop.f32.mrb[11].mxu1  ;;  %v858_v20 = vpop.f32.mrb[11].mxu0 }
 0x1c5   : > { %v1114_v21 = vpack.c.bf16 %v630_v19, %v630_v19  ;;  %930 = vst.msk [vmem:[%s1458_s22 + $0x10] sm:$0xff] %vm927_vm1, %v858_v20 }
 0x1c6   : > { %767 = vst.msk [vmem:[%s1463_s25 + $0xc] sm:$0xf] %vm763_vm2, %v1115_v18 }
 0x1c7   : > { %766 = vst.msk [vmem:[%s1463_s25 + $0x8] sm:$0xf] %vm763_vm2, %v1114_v21  ;;  %v1222_v22 = vpop.f32.mrb[12].mxu1  ;;  %v1250_v23 = vpop.f32.mrb[12].mxu0 }
 0x1c8   : > { %v1117_v24 = vpack.c.bf16 %v1222_v22, %v1222_v22  ;;  %933 = vst.msk [vmem:[%s1458_s22 + $0x28] sm:$0xff] %vm927_vm1, %v1250_v23  ;;  %v640_v25 = vpop.f32.mrb[13].mxu1  ;;  %v868_v26 = vpop.f32.mrb[13].mxu0 }
 0x1c9   : > { %v1116_v27 = vpack.c.bf16 %v640_v25, %v640_v25  ;;  %932 = vst.msk [vmem:[%s1458_s22 + $0x20] sm:$0xff] %vm927_vm1, %v868_v26 }
 0x1ca   : > { %769 = vst.msk [vmem:[%s1463_s25 + $0x14] sm:$0xf] %vm763_vm2, %v1117_v24 }
 0x1cb   : > { %768 = vst.msk [vmem:[%s1463_s25 + $0x10] sm:$0xf] %vm763_vm2, %v1116_v27  ;;  %v1225_v28 = vpop.f32.mrb[14].mxu1  ;;  %v1253_v29 = vpop.f32.mrb[14].mxu0 }
 0x1cc   : > { %v1119_v30 = vpack.c.bf16 %v1225_v28, %v1225_v28  ;;  %935 = vst.msk [vmem:[%s1458_s22 + $0x38] sm:$0xff] %vm927_vm1, %v1253_v29  ;;  %v650_v31 = vpop.f32.mrb[15].mxu1  ;;  %v878_v32 = vpop.f32.mrb[15].mxu0 }
 0x1cd   : > { %v1118_v33 = vpack.c.bf16 %v650_v31, %v650_v31  ;;  %934 = vst.msk [vmem:[%s1458_s22 + $0x30] sm:$0xff] %vm927_vm1, %v878_v32 }
 0x1ce   : > { %771 = vst.msk [vmem:[%s1463_s25 + $0x1c] sm:$0xf] %vm763_vm2, %v1119_v30 }
 0x1cf   : > { %770 = vst.msk [vmem:[%s1463_s25 + $0x18] sm:$0xf] %vm763_vm2, %v1118_v33  ;;  %v1228_v34 = vpop.f32.mrb[16].mxu1  ;;  %v1256_v35 = vpop.f32.mrb[16].mxu0 }
 0x1d0   : > { %v1121_v36 = vpack.c.bf16 %v1228_v34, %v1228_v34  ;;  %937 = vst.msk [vmem:[%s1458_s22 + $0x48] sm:$0xff] %vm927_vm1, %v1256_v35  ;;  %v660_v37 = vpop.f32.mrb[17].mxu1  ;;  %v888_v38 = vpop.f32.mrb[17].mxu0 }
 0x1d1   : > { %v1120_v39 = vpack.c.bf16 %v660_v37, %v660_v37  ;;  %936 = vst.msk [vmem:[%s1458_s22 + $0x40] sm:$0xff] %vm927_vm1, %v888_v38 }
 0x1d2   : > { %773 = vst.msk [vmem:[%s1463_s25 + $0x24] sm:$0xf] %vm763_vm2, %v1121_v36 }
 0x1d3   : > { %772 = vst.msk [vmem:[%s1463_s25 + $0x20] sm:$0xf] %vm763_vm2, %v1120_v39  ;;  %v1231_v40 = vpop.f32.mrb[18].mxu1  ;;  %v1259_v41 = vpop.f32.mrb[18].mxu0 }
 0x1d4   : > { %v1123_v42 = vpack.c.bf16 %v1231_v40, %v1231_v40  ;;  %939 = vst.msk [vmem:[%s1458_s22 + $0x58] sm:$0xff] %vm927_vm1, %v1259_v41  ;;  %v670_v43 = vpop.f32.mrb[19].mxu1  ;;  %v898_v44 = vpop.f32.mrb[19].mxu0 }
 0x1d5   : > { %v1122_v45 = vpack.c.bf16 %v670_v43, %v670_v43  ;;  %938 = vst.msk [vmem:[%s1458_s22 + $0x50] sm:$0xff] %vm927_vm1, %v898_v44 }
 0x1d6   : > { %775 = vst.msk [vmem:[%s1463_s25 + $0x2c] sm:$0xf] %vm763_vm2, %v1123_v42 }
 0x1d7   : > { %774 = vst.msk [vmem:[%s1463_s25 + $0x28] sm:$0xf] %vm763_vm2, %v1122_v45  ;;  %v1234_v46 = vpop.f32.mrb[20].mxu1  ;;  %v1262_v47 = vpop.f32.mrb[20].mxu0 }
 0x1d8   : > { %v1125_v48 = vpack.c.bf16 %v1234_v46, %v1234_v46  ;;  %941 = vst.msk [vmem:[%s1458_s22 + $0x68] sm:$0xff] %vm927_vm1, %v1262_v47  ;;  %v680_v49 = vpop.f32.mrb[21].mxu1  ;;  %v908_v50 = vpop.f32.mrb[21].mxu0 }
 0x1d9   : > { %v1124_v51 = vpack.c.bf16 %v680_v49, %v680_v49  ;;  %940 = vst.msk [vmem:[%s1458_s22 + $0x60] sm:$0xff] %vm927_vm1, %v908_v50 }
 0x1da   : > { %777 = vst.msk [vmem:[%s1463_s25 + $0x34] sm:$0xf] %vm763_vm2, %v1125_v48 }
 0x1db   : > { %776 = vst.msk [vmem:[%s1463_s25 + $0x30] sm:$0xf] %vm763_vm2, %v1124_v51  ;;  %v1237_v52 = vpop.f32.mrb[22].mxu1  ;;  %v1265_v53 = vpop.f32.mrb[22].mxu0 }
 0x1dc   : > { %v1127_v54 = vpack.c.bf16 %v1237_v52, %v1237_v52  ;;  %943 = vst.msk [vmem:[%s1458_s22 + $0x78] sm:$0xff] %vm927_vm1, %v1265_v53  ;;  %v690_v55 = vpop.f32.mrb[23].mxu1  ;;  %v918_v56 = vpop.f32.mrb[23].mxu0 }
 0x1dd   : > { %v1126_v57 = vpack.c.bf16 %v690_v55, %v690_v55  ;;  %942 = vst.msk [vmem:[%s1458_s22 + $0x70] sm:$0xff] %vm927_vm1, %v918_v56 }
 0x1de   : > { %779 = vst.msk [vmem:[%s1463_s25 + $0x3c] sm:$0xf] %vm763_vm2, %v1127_v54 }
 0x1df   : > { %778 = vst.msk [vmem:[%s1463_s25 + $0x38] sm:$0xf] %vm763_vm2, %v1126_v57 }
 0x1e0 PF: > { %s17_s21 = sadd.s32 1, %s1294_s21  }
 0x1e1   : > { %p14_p4 = scmp.ge.s32.totalorder %s17_s21, 8  }
 0x1e3   :  { %16 = sbr.rel (!%p14_p4) target bundleno = 1 (0x1), region = 82 }

// kernel: net2_forward.3
= control target key start
LH: loop header
LB: loop body
LE: loop exit
PB: predicated region body
PF: predicated region fallthrough
CT: control target
= control target key end

     0   :  { %s1777_s24 = smov 0   ;;  %s1779_s25 = smov 0   ;;  %s2085_s0 = inlined_call_operand.vmem [shape: bf16[768,768], index: 0, kind: input, shape index: {}]   ;;  %s2086_s1 = inlined_call_operand.vmem [shape: bf16[768,32], index: 1, kind: input, shape index: {}]   ;;  %s2087_s2 = inlined_call_operand.vmem [shape: f32[768,32], index: 2, kind: input, shape index: {}]   ;;  %s2088_s3 = inlined_call_operand.vmem [shape: f32[768,1], index: 3, kind: input, shape index: {}]   ;;  %s2089_s4 = inlined_call_operand.vmem [shape: f32[1,32], index: 4, kind: input, shape index: {}]   ;;  %s2090_s5 = inlined_call_operand.vmem [shape: f32[32,32], index: 5, kind: input, shape index: {}]   ;;  %s2091_s6 = inlined_call_operand.vmem [shape: f32[1,32], index: 6, kind: input, shape index: {}]   ;;  %s2092_s7 = inlined_call_operand.vmem [shape: f32[768,32], index: 7, kind: output, shape index: {}]  }
   0x1   :  { %s1781_s26 = smov 0   ;;  %s1783_s27 = smov 0  }
   0x2   :  { %s1785_s28 = smov 0   ;;  %s1787_s29 = smov 0  }
   0x3   :  { %s1789_s30 = smov 0  }
   0x4 LB: > { %s26_s8 = sadd.s32 1, %s1725_s28  ;;  %s29_s9 = sadd.s32 1, %s1729_s29  ;;  %s1733_s30 = sphi %s1789_s30, %s17_s30   ;;  %s1729_s29 = sphi %s1787_s29, %s2098_s29   ;;  %s1725_s28 = sphi %s1785_s28, %s2097_s28   ;;  %s1721_s27 = sphi %s1783_s27, %s2096_s27   ;;  %s1717_s26 = sphi %s1781_s26, %s2095_s26   ;;  %s1713_s25 = sphi %s1779_s25, %s2094_s25   ;;  %s1709_s24 = sphi %s1777_s24, %s2093_s24  }
   0x5   : > { %p27_p0 = scmp.ge.s32.totalorder %s26_s8, 3  ;;  %p45_p1 = scmp.ne.s32.totalorder %s1713_s25, %s1709_s24 }
   0x6   : > { %p46_p2 = scmp.eq.s32.totalorder %s1733_s30, 0  ;;  %s38_s13 = sadd.s32 1, %s1713_s25 }
   0x7   : > { %s2100_s8 = smov (%p27_p0, %s26_s8), 0  ;;  %s2102_s9 = smov (!%p27_p0, %s29_s9), %s1729_s29 }
   0x8   : > { %p47_p3 = por %p46_p2, %p45_p1  ;;  %p31_p4 = scmp.ge.s32.totalorder %s2102_s9, 6 }
   0x9   : > { %s34_s10 = ssub.s32 %s1725_s28, %s2100_s8  ;;  %p1364_p6 = scmp.ge.s32.totalorder %s1733_s30, 18 }
   0xa   : > { %s2104_s9 = smov (%p31_p4, %s2102_s9), 0 }
   0xb   : > { %s33_s11 = ssub.s32 %s1729_s29, %s2104_s9  ;;  %245 = sbr.rel (%p1364_p6) target bundleno = 34 (0x22), region = 32 }
   0xc   : > { %s35_s12 = sor.u32 %s34_s10, %s33_s11 }
   0xd   : > { %p36_p5 = scmp.eq.s32.totalorder %s35_s12, 0 }
   0xf   : > { %s1828_s14 = scalar_select %p36_p5, %s1713_s25, %s38_s13  }
  0x12   : > { %248 = sbr.rel (!%p47_p3) target bundleno = 34 (0x22), region = 36  ;;  %s250_s15 = sand.u32 (%p47_p3), 1, %s1713_s25  }
  0x13   : > { %s1367_s16 = sshll.u32 (%p47_p3), %s1725_s28, 1  ;;  %s1365_s17 = sshll.u32 (%p47_p3), %s250_s15, 7 }
  0x14   : > { %s1578_s18 = smul.u32 (%p47_p3), 96, %s1729_s29  ;;  %s252_s10 = scalar_lea.vmem (%p47_p3), [#allocation3], %s1365_s17 }
  0x16   : > { %s256_s19 = sadd.s32 (%p47_p3), %s1578_s18, %s1367_s16 }
  0x17   : > { %s1369_s20 = sshll.u32 (%p47_p3), %s256_s19, 2 }
  0x18   : > { %s1837_s23 = scalar_lea.vmem (%p47_p3), %s2085_s0, %s1369_s20 }
  0x19   : > { %v316_v0 = vld [vmem:[%s1837_s23] sm:$0xff]  ;;  %v318_v1 = vld [vmem:[%s1837_s23 + $0x18] sm:$0xff]  ;;  %v320_v2 = vld [vmem:[%s1837_s23 + $0x30] sm:$0xff] }
  0x1a   : > { %317 = vst [vmem:[%s252_s10] sm:$0xff] %v316_v0  ;;  %319 = vst [vmem:[%s252_s10 + $0x8] sm:$0xff] %v318_v1  ;;  %v322_v3 = vld [vmem:[%s1837_s23 + $0x48] sm:$0xff]  ;;  %v324_v4 = vld [vmem:[%s1837_s23 + $0x60] sm:$0xff] }
  0x1b   : > { %321 = vst [vmem:[%s252_s10 + $0x10] sm:$0xff] %v320_v2  ;;  %v326_v5 = vld [vmem:[%s1837_s23 + $0x78] sm:$0xff]  ;;  %323 = vst [vmem:[%s252_s10 + $0x18] sm:$0xff] %v322_v3  ;;  %v328_v6 = vld [vmem:[%s1837_s23 + $0x90] sm:$0xff] }
  0x1c   : > { %325 = vst [vmem:[%s252_s10 + $0x20] sm:$0xff] %v324_v4  ;;  %327 = vst [vmem:[%s252_s10 + $0x28] sm:$0xff] %v326_v5  ;;  %v330_v7 = vld [vmem:[%s1837_s23 + $0xa8] sm:$0xff]  ;;  %v332_v8 = vld [vmem:[%s1837_s23 + $0xc0] sm:$0xff] }
  0x1d   : > { %329 = vst [vmem:[%s252_s10 + $0x30] sm:$0xff] %v328_v6  ;;  %331 = vst [vmem:[%s252_s10 + $0x38] sm:$0xff] %v330_v7  ;;  %v334_v9 = vld [vmem:[%s1837_s23 + $0xd8] sm:$0xff]  ;;  %v336_v10 = vld [vmem:[%s1837_s23 + $0xf0] sm:$0xff] }
  0x1e   : > { %333 = vst [vmem:[%s252_s10 + $0x40] sm:$0xff] %v332_v8  ;;  %v338_v11 = vld [vmem:[%s1837_s23 + $0x108] sm:$0xff]  ;;  %335 = vst [vmem:[%s252_s10 + $0x48] sm:$0xff] %v334_v9  ;;  %v340_v12 = vld [vmem:[%s1837_s23 + $0x120] sm:$0xff] }
  0x1f   : > { %337 = vst [vmem:[%s252_s10 + $0x50] sm:$0xff] %v336_v10  ;;  %339 = vst [vmem:[%s252_s10 + $0x58] sm:$0xff] %v338_v11  ;;  %v342_v13 = vld [vmem:[%s1837_s23 + $0x138] sm:$0xff]  ;;  %v344_v14 = vld [vmem:[%s1837_s23 + $0x150] sm:$0xff] }
  0x20   : > { %341 = vst [vmem:[%s252_s10 + $0x60] sm:$0xff] %v340_v12  ;;  %343 = vst [vmem:[%s252_s10 + $0x68] sm:$0xff] %v342_v13  ;;  %v346_v15 = vld [vmem:[%s1837_s23 + $0x168] sm:$0xff] }
  0x21   : > { %345 = vst [vmem:[%s252_s10 + $0x70] sm:$0xff] %v344_v14  ;;  %347 = vst [vmem:[%s252_s10 + $0x78] sm:$0xff] %v346_v15 }
  0x22 PF: > { %p1370_p7 = scmp.ge.s32.totalorder %s1733_s30, 1  ;;  %p370_p8 = scmp.lt.s32.totalorder %s1733_s30, 19 }
  0x24   : > { %p371_p9 = pnand %p1370_p7, %p370_p8 }
  0x25   : > { %s377_s11 = sand.u32 (!%p371_p9), 1, %s1709_s24   ;;  %s1372_s12 = sshll.u32 (!%p371_p9), %s1721_s27, 4 }
  0x26   : > { %374 = sbr.rel (%p371_p9) target bundleno = 693 (0x2b5), region = 82  ;;  %s1371_s13 = sshll.u32 (!%p371_p9), %s377_s11, 7 }
  0x27   : > { %p421_p10 = scmp.lt.s32.totalorder (!%p371_p9), %s1372_s12, 95  ;;  %s1874_s24 = scalar_lea.vmem (!%p371_p9), [#allocation3], %s1371_s13 }
  0x28   : > { %p1378_p11 = scmp.ne.s32.totalorder (!%p371_p9), %s1717_s26, 0 }
  0x2d   : > { %s2106_s12 = smov (!%p421_p10, %s1372_s12), 95  ;;  %442 = sbr.rel (%p1378_p11) target bundleno = 55 (0x37), region = 90 }
  0x2e   : > { %s1373_s15 = sshll.u32 %s2106_s12, 3  ;;  %vm443_vm0 = vcmask (!%p1378_p11), 261120   ;;  %v1735_v16 = vmov (!%p1378_p11), 0.0  }
  0x2f   : > { %s1862_s18 = scalar_lea.vmem %s2087_s2, %s1373_s15  ;;  %s1867_s21 = scalar_lea.vmem %s2088_s3, %s1373_s15  ;;  %444 = vst.msk [vmem:[#allocation2] sm:$0xff] (!%p1378_p11), %vm443_vm0, %v1735_v16  ;;  %445 = vst.msk [vmem:[#allocation2 + $0x8] sm:$0xff] (!%p1378_p11), %vm443_vm0, %v1735_v16 }
  0x30   : > { %s1872_s10 = scalar_lea.vmem %s2092_s7, %s1373_s15  ;;  %446 = vst.msk [vmem:[#allocation2 + $0x10] sm:$0xff] (!%p1378_p11), %vm443_vm0, %v1735_v16  ;;  %447 = vst.msk [vmem:[#allocation2 + $0x18] sm:$0xff] (!%p1378_p11), %vm443_vm0, %v1735_v16 }
  0x31   : > { %448 = vst.msk [vmem:[#allocation2 + $0x20] sm:$0xff] (!%p1378_p11), %vm443_vm0, %v1735_v16  ;;  %449 = vst.msk [vmem:[#allocation2 + $0x28] sm:$0xff] (!%p1378_p11), %vm443_vm0, %v1735_v16 }
  0x32   : > { %450 = vst.msk [vmem:[#allocation2 + $0x30] sm:$0xff] (!%p1378_p11), %vm443_vm0, %v1735_v16  ;;  %451 = vst.msk [vmem:[#allocation2 + $0x38] sm:$0xff] (!%p1378_p11), %vm443_vm0, %v1735_v16 }
  0x33   : > { %452 = vst.msk [vmem:[#allocation2 + $0x40] sm:$0xff] (!%p1378_p11), %vm443_vm0, %v1735_v16  ;;  %453 = vst.msk [vmem:[#allocation2 + $0x48] sm:$0xff] (!%p1378_p11), %vm443_vm0, %v1735_v16 }
  0x34   : > { %454 = vst.msk [vmem:[#allocation2 + $0x50] sm:$0xff] %vm443_vm0, %v1735_v16  ;;  %455 = vst.msk [vmem:[#allocation2 + $0x58] sm:$0xff] %vm443_vm0, %v1735_v16 }
  0x35   : > { %456 = vst.msk [vmem:[#allocation2 + $0x60] sm:$0xff] %vm443_vm0, %v1735_v16  ;;  %457 = vst.msk [vmem:[#allocation2 + $0x68] sm:$0xff] %vm443_vm0, %v1735_v16 }
  0x36   : > { %458 = vst.msk [vmem:[#allocation2 + $0x70] sm:$0xff] %vm443_vm0, %v1735_v16  ;;  %459 = vst.msk [vmem:[#allocation2 + $0x78] sm:$0xff] %vm443_vm0, %v1735_v16 }
  0x37 PF: > { %s1379_s27 = sshll.u32 %s1717_s26, 8  ;;  %v1655_v17 = vld [vmem:[%s1874_s24 + $0x4] ss:$8 sps:$4 sm:$0xff]   ;;  %v1653_v35 = vld [vmem:[%s1874_s24] ss:$8 sps:$4 sm:$0xff]   ;;  %vm818_vm1 = vcmask 261120  }
  0x38   : > { %s493_s11 = sshra.s32 %s1379_s27, 3  ;;  %v1658_v18 = vld [vmem:[%s1874_s24 + $0x44] ss:$8 sps:$4 sm:$0xff]   ;;  %737 = vmatprep.mubr.bf16.mxu0 %v1655_v17  ;;  %v1656_v36 = vld [vmem:[%s1874_s24 + $0x40] ss:$8 sps:$4 sm:$0xff]   ;;  %p1413_p12 = scmp.ne.s32.totalorder %s1717_s26, 2 }
  0x39   : > { %s1380_s12 = sshll.u32 %s493_s11, 2  ;;  %769 = vmatprep.mubr.bf16.mxu1 %v1658_v18  ;;  %v1659_v37 = vld [vmem:[%s1874_s24 + $0x14] ss:$8 sps:$4 sm:$0xff]   ;;  %v1663_v39 = vld [vmem:[%s1874_s24 + $0x10] ss:$8 sps:$4 sm:$0xff]   ;;  %v461_v51 = vld [vmem:[#allocation2] sm:$0xff] }
  0x3a   : > { %s1899_s16 = scalar_lea.vmem %s2086_s1, %s1380_s12  ;;  %v1661_v38 = vld [vmem:[%s1874_s24 + $0x54] ss:$8 sps:$4 sm:$0xff]   ;;  %v1664_v40 = vld [vmem:[%s1874_s24 + $0x50] ss:$8 sps:$4 sm:$0xff]   ;;  %v1665_v41 = vld [vmem:[%s1874_s24 + $0x24] ss:$8 sps:$4 sm:$0xff]  }
  0x3b   : > { %v1637_v19 = vld [vmem:[%s1899_s16 + $0x40] sm:$0xff]   ;;  %v1639_v21 = vld [vmem:[%s1899_s16 + $0x48] sm:$0xff]   ;;  %v1641_v23 = vld [vmem:[%s1899_s16 + $0x50] sm:$0xff]  }
  0x3c   : > { %v1638_v20 = vld [vmem:[%s1899_s16] sm:$0xff]   ;;  %1434 = vmatprep.subr.bf16.mxu0 %v1637_v19  ;;  %1558 = vmatprep.subr.bf16.mxu1 %v1637_v19  ;;  %v1640_v22 = vld [vmem:[%s1899_s16 + $0x8] sm:$0xff]   ;;  %v1642_v24 = vld [vmem:[%s1899_s16 + $0x10] sm:$0xff]  }
  0x3d   : > { %1435 = vmatpush3.bf16.msra.mxu0 %v1638_v20  ;;  %1566 = vmatpush3.bf16.msra.mxu1 %v1638_v20  ;;  %v1643_v25 = vld [vmem:[%s1899_s16 + $0x58] sm:$0xff]   ;;  %v1645_v27 = vld [vmem:[%s1899_s16 + $0x60] sm:$0xff]   ;;  %v1647_v29 = vld [vmem:[%s1899_s16 + $0x68] sm:$0xff]  }
  0x3e   : > { %1436 = vmatprep.subr.bf16.mxu0 %v1639_v21  ;;  %1559 = vmatprep.subr.bf16.mxu1 %v1639_v21  ;;  %v1644_v26 = vld [vmem:[%s1899_s16 + $0x18] sm:$0xff]   ;;  %v1646_v28 = vld [vmem:[%s1899_s16 + $0x20] sm:$0xff]   ;;  %v1648_v30 = vld [vmem:[%s1899_s16 + $0x28] sm:$0xff]  }
  0x3f   : > { %v1649_v31 = vld [vmem:[%s1899_s16 + $0x70] sm:$0xff]   ;;  %v1651_v33 = vld [vmem:[%s1899_s16 + $0x78] sm:$0xff]   ;;  %v1667_v42 = vld [vmem:[%s1874_s24 + $0x64] ss:$8 sps:$4 sm:$0xff]  }
  0x40   : > { %v1650_v32 = vld [vmem:[%s1899_s16 + $0x30] sm:$0xff]   ;;  %v1652_v34 = vld [vmem:[%s1899_s16 + $0x38] sm:$0xff]   ;;  %v1669_v43 = vld [vmem:[%s1874_s24 + $0x20] ss:$8 sps:$4 sm:$0xff]  }
  0x41   : > { %1437 = vmatpush3.bf16.msra.mxu0 %v1640_v22  ;;  %1567 = vmatpush3.bf16.msra.mxu1 %v1640_v22  ;;  %v1670_v44 = vld [vmem:[%s1874_s24 + $0x60] ss:$8 sps:$4 sm:$0xff]   ;;  %v1671_v45 = vld [vmem:[%s1874_s24 + $0x34] ss:$8 sps:$4 sm:$0xff]   ;;  %v1675_v47 = vld [vmem:[%s1874_s24 + $0x30] ss:$8 sps:$4 sm:$0xff]  }
  0x42   : > { %1438 = vmatprep.subr.bf16.mxu0 %v1641_v23  ;;  %1560 = vmatprep.subr.bf16.mxu1 %v1641_v23  ;;  %v1673_v46 = vld [vmem:[%s1874_s24 + $0x74] ss:$8 sps:$4 sm:$0xff]   ;;  %v1676_v48 = vld [vmem:[%s1874_s24 + $0x70] ss:$8 sps:$4 sm:$0xff]   ;;  %v469_v53 = vld [vmem:[#allocation2 + $0x40] sm:$0xff] }
  0x43   : > { %v462_v59 = vld [vmem:[#allocation2 + $0x8] sm:$0xff]  ;;  %v463_v7 = vld [vmem:[#allocation2 + $0x10] sm:$0xff]  ;;  %v464_v15 = vld [vmem:[#allocation2 + $0x18] sm:$0xff] }
  0x44   : > { %v470_v61 = vld [vmem:[#allocation2 + $0x48] sm:$0xff]  ;;  %v471_v9 = vld [vmem:[#allocation2 + $0x50] sm:$0xff]  ;;  %v472_v17 = vld [vmem:[#allocation2 + $0x58] sm:$0xff] }
  0x45   : > { %1439 = vmatpush3.bf16.msra.mxu0 %v1642_v24  ;;  %1568 = vmatpush3.bf16.msra.mxu1 %v1642_v24 }
  0x46   : > { %1440 = vmatprep.subr.bf16.mxu0 %v1643_v25  ;;  %1561 = vmatprep.subr.bf16.mxu1 %v1643_v25 }
  0x49   : > { %1441 = vmatpush3.bf16.msra.mxu0 %v1644_v26  ;;  %1569 = vmatpush3.bf16.msra.mxu1 %v1644_v26 }
  0x4a   : > { %1442 = vmatprep.subr.bf16.mxu0 %v1645_v27  ;;  %1562 = vmatprep.subr.bf16.mxu1 %v1645_v27  ;;  %v465_v27 = vld [vmem:[#allocation2 + $0x20] sm:$0xff] }
  0x4d   : > { %1443 = vmatpush3.bf16.msra.mxu0 %v1646_v28  ;;  %1570 = vmatpush3.bf16.msra.mxu1 %v1646_v28 }
  0x4e   : > { %1444 = vmatprep.subr.bf16.mxu0 %v1647_v29  ;;  %1563 = vmatprep.subr.bf16.mxu1 %v1647_v29  ;;  %v473_v29 = vld [vmem:[#allocation2 + $0x60] sm:$0xff] }
  0x51   : > { %1445 = vmatpush3.bf16.msra.mxu0 %v1648_v30  ;;  %1571 = vmatpush3.bf16.msra.mxu1 %v1648_v30 }
  0x52   : > { %1446 = vmatprep.subr.bf16.mxu0 %v1649_v31  ;;  %1564 = vmatprep.subr.bf16.mxu1 %v1649_v31 }
  0x55   : > { %1447 = vmatpush3.bf16.msra.mxu0 %v1650_v32  ;;  %1572 = vmatpush3.bf16.msra.mxu1 %v1650_v32 }
  0x56   : > { %1448 = vmatprep.subr.bf16.mxu0 %v1651_v33  ;;  %1565 = vmatprep.subr.bf16.mxu1 %v1651_v33 }
  0x59   : > { %1449 = vmatpush3.bf16.msra.mxu0 %v1652_v34  ;;  %1573 = vmatpush3.bf16.msra.mxu1 %v1652_v34 }
  0x5c   : > { %738 = vmatmul.mubr.bf16.vlgmr.msra.gmra.mrb[0].mxu0 %v1653_v35  ;;  %770 = vmatmul.mubr.bf16.vlgmr.msra.gmra.mrb[0].mxu1 %v1656_v36  ;;  %v466_v35 = vld [vmem:[#allocation2 + $0x28] sm:$0xff] }
  0x5d   : > { %745 = vmatprep.mubr.bf16.mxu0 %v1659_v37  ;;  %777 = vmatprep.mubr.bf16.mxu1 %v1661_v38  ;;  %v474_v37 = vld [vmem:[#allocation2 + $0x68] sm:$0xff] }
  0x64   : > { %746 = vmatmul.mubr.bf16.gmra.mrb[4].mxu0 %v1663_v39  ;;  %778 = vmatmul.mubr.bf16.gmra.mrb[4].mxu1 %v1664_v40 }
  0x65   : > { %753 = vmatprep.mubr.bf16.mxu0 %v1665_v41  ;;  %785 = vmatprep.mubr.bf16.mxu1 %v1667_v42 }
  0x6c   : > { %754 = vmatmul.mubr.bf16.gmra.mrb[8].mxu0 %v1669_v43  ;;  %786 = vmatmul.mubr.bf16.gmra.mrb[8].mxu1 %v1670_v44 }
  0x6d   : > { %761 = vmatprep.mubr.bf16.mxu0 %v1671_v45  ;;  %793 = vmatprep.mubr.bf16.mxu1 %v1673_v46 }
  0x74   : > { %762 = vmatmul.mubr.bf16.gmra.mrb[12].mxu0 %v1675_v47  ;;  %794 = vmatmul.mubr.bf16.gmra.mrb[12].mxu1 %v1676_v48  ;;  %v467_v47 = vld [vmem:[#allocation2 + $0x30] sm:$0xff] }
 0x12f   : > { %v1450_v49 = vpop.f32.mrb[0].mxu0  ;;  %v1474_v50 = vpop.f32.mrb[0].mxu1 }
 0x130   : > { %v1451_v52 = vpop.f32.mrb[1].mxu0  ;;  %v1475_v54 = vpop.f32.mrb[1].mxu1 }
 0x131   : > { %v1452_v55 = vadd.f32 %v1451_v52, %v1450_v49  ;;  %v1476_v56 = vadd.f32 %v1475_v54, %v1474_v50  ;;  %v1453_v57 = vpop.f32.mrb[2].mxu0  ;;  %v1477_v58 = vpop.f32.mrb[2].mxu1  ;;  %v475_v49 = vld [vmem:[#allocation2 + $0x70] sm:$0xff] }
 0x132   : > { %v1454_v60 = vpop.f32.mrb[3].mxu0  ;;  %v1478_v62 = vpop.f32.mrb[3].mxu1 }
 0x133   : > { %v802_v63 = vadd.f32 %v1452_v55, %v461_v51  ;;  %v810_v0 = vadd.f32 %v1476_v56, %v469_v53  ;;  %v1455_v1 = vadd.f32 %v1454_v60, %v1453_v57  ;;  %v1479_v2 = vadd.f32 %v1478_v62, %v1477_v58  ;;  %v468_v55 = vld [vmem:[#allocation2 + $0x38] sm:$0xff] }
 0x134   : > { %v476_v57 = vld [vmem:[#allocation2 + $0x78] sm:$0xff] }
 0x135   : > { %819 = vst.msk [vmem:[#allocation2] sm:$0xff] %vm818_vm1, %v802_v63  ;;  %827 = vst.msk [vmem:[#allocation2 + $0x40] sm:$0xff] %vm818_vm1, %v810_v0  ;;  %v803_v3 = vadd.f32 %v1455_v1, %v462_v59  ;;  %v811_v4 = vadd.f32 %v1479_v2, %v470_v61  ;;  %v840_v1 = vld [vmem:[%s1867_s21 + $0x8] sm:$0xff] (!%p1413_p12)  ;;  %v839_v2 = vld [vmem:[%s1867_s21] sm:$0xff] (!%p1413_p12) }
 0x137   : > { %820 = vst.msk [vmem:[#allocation2 + $0x8] sm:$0xff] %vm818_vm1, %v803_v3  ;;  %828 = vst.msk [vmem:[#allocation2 + $0x48] sm:$0xff] %vm818_vm1, %v811_v4  ;;  %v1456_v5 = vpop.f32.mrb[4].mxu0  ;;  %v1480_v6 = vpop.f32.mrb[4].mxu1  ;;  %v1736_v3 = vmov (!%p1413_p12), 0   ;;  %v848_v4 = vld [vmem:[%s1867_s21 + $0x48] sm:$0xff] (!%p1413_p12) }
 0x138   : > { %v1457_v8 = vpop.f32.mrb[5].mxu0  ;;  %v1481_v10 = vpop.f32.mrb[5].mxu1  ;;  %1678 = vset.pattern.permute.xlu1 (!%p1413_p12), %v1736_v3  ;;  %1677 = vset.pattern.permute.xlu0 (!%p1413_p12), %v1736_v3 }
 0x139   : > { %v1458_v11 = vadd.f32 %v1457_v8, %v1456_v5  ;;  %v1482_v12 = vadd.f32 %v1481_v10, %v1480_v6  ;;  %v1459_v13 = vpop.f32.mrb[6].mxu0  ;;  %v1483_v14 = vpop.f32.mrb[6].mxu1  ;;  %878 = vperm.xlu1 (!%p1413_p12), %1678, %v840_v1   ;;  %873 = vperm.xlu0 (!%p1413_p12), %1677, %v839_v2   ;;  %v847_v5 = vld [vmem:[%s1867_s21 + $0x40] sm:$0xff] (!%p1413_p12)  ;;  %v849_v8 = vld [vmem:[%s1867_s21 + $0x50] sm:$0xff] (!%p1413_p12) }
 0x13a   : > { %v1460_v16 = vpop.f32.mrb[7].mxu0  ;;  %v1484_v18 = vpop.f32.mrb[7].mxu1  ;;  %v1038_v6 = vld [vmem:[%s2090_s5] sm:$0xff] (!%p1413_p12) }
 0x13b   : > { %v804_v19 = vadd.f32 %v1458_v11, %v463_v7  ;;  %v812_v20 = vadd.f32 %v1482_v12, %v471_v9  ;;  %v1461_v21 = vadd.f32 %v1460_v16, %v1459_v13  ;;  %v1485_v22 = vadd.f32 %v1484_v18, %v1483_v14  ;;  %v1039_v7 = vld [vmem:[%s2090_s5 + $0x8] sm:$0xff] (!%p1413_p12)  ;;  %v841_v9 = vld [vmem:[%s1867_s21 + $0x10] sm:$0xff] (!%p1413_p12)  ;;  %v1041_v12 = vld [vmem:[%s2090_s5 + $0x18] sm:$0xff] (!%p1413_p12) }
 0x13c   : > { %v1550_v10 = vpack.c.bf16 (!%p1413_p12), %v1039_v7, %v1038_v6  ;;  %v1040_v11 = vld [vmem:[%s2090_s5 + $0x10] sm:$0xff] (!%p1413_p12)  ;;  %v850_v14 = vld [vmem:[%s1867_s21 + $0x58] sm:$0xff] (!%p1413_p12)  ;;  %v851_v16 = vld [vmem:[%s1867_s21 + $0x60] sm:$0xff] (!%p1413_p12) }
 0x13d   : > { %821 = vst.msk [vmem:[#allocation2 + $0x10] sm:$0xff] %vm818_vm1, %v804_v19  ;;  %829 = vst.msk [vmem:[#allocation2 + $0x50] sm:$0xff] %vm818_vm1, %v812_v20  ;;  %v805_v23 = vadd.f32 %v1461_v21, %v464_v15  ;;  %v813_v24 = vadd.f32 %v1485_v22, %v472_v17  ;;  %918 = vperm.xlu1 (!%p1413_p12), %1678, %v848_v4   ;;  %913 = vperm.xlu0 (!%p1413_p12), %1677, %v847_v5   ;;  %v842_v15 = vld [vmem:[%s1867_s21 + $0x18] sm:$0xff] (!%p1413_p12)  ;;  %v843_v17 = vld [vmem:[%s1867_s21 + $0x20] sm:$0xff] (!%p1413_p12) }
 0x13e   : > { %1551 = vmatprep.subr.bf16.mxu0 (!%p1413_p12), %v1550_v10  ;;  %1574 = vmatprep.subr.bf16.mxu1 (!%p1413_p12), %v1550_v10  ;;  %v1554_v13 = vpack.c.bf16 (!%p1413_p12), %v1041_v12, %v1040_v11  ;;  %v852_v18 = vld [vmem:[%s1867_s21 + $0x68] sm:$0xff] (!%p1413_p12)  ;;  %v853_v20 = vld [vmem:[%s1867_s21 + $0x70] sm:$0xff] (!%p1413_p12)  ;;  %v854_v22 = vld [vmem:[%s1867_s21 + $0x78] sm:$0xff] (!%p1413_p12) }
 0x13f   : > { %822 = vst.msk [vmem:[#allocation2 + $0x18] sm:$0xff] %vm818_vm1, %v805_v23  ;;  %830 = vst.msk [vmem:[#allocation2 + $0x58] sm:$0xff] %vm818_vm1, %v813_v24  ;;  %v1462_v25 = vpop.f32.mrb[8].mxu0  ;;  %v1486_v26 = vpop.f32.mrb[8].mxu1  ;;  %1553 = vmatpush3.bf16.msra.mxu0 (!%p1413_p12), %v1550_v10  ;;  %1576 = vmatpush3.bf16.msra.mxu1 (!%p1413_p12), %v1550_v10  ;;  %v844_v19 = vld [vmem:[%s1867_s21 + $0x28] sm:$0xff] (!%p1413_p12)  ;;  %v845_v21 = vld [vmem:[%s1867_s21 + $0x30] sm:$0xff] (!%p1413_p12) }
 0x140   : > { %v1463_v28 = vpop.f32.mrb[9].mxu0  ;;  %v1487_v30 = vpop.f32.mrb[9].mxu1  ;;  %1555 = vmatprep.subr.bf16.mxu0 (!%p1413_p12), %v1554_v13  ;;  %1575 = vmatprep.subr.bf16.mxu1 (!%p1413_p12), %v1554_v13  ;;  %v846_v23 = vld [vmem:[%s1867_s21 + $0x38] sm:$0xff] (!%p1413_p12)  ;;  %v856_v24 = vld [vmem:[#allocation2 + $0x8] sm:$0xff] (!%p1413_p12) }
 0x141   : > { %v1464_v31 = vadd.f32 %v1463_v28, %v1462_v25  ;;  %v1488_v32 = vadd.f32 %v1487_v30, %v1486_v26  ;;  %v1465_v33 = vpop.f32.mrb[10].mxu0  ;;  %v1489_v34 = vpop.f32.mrb[10].mxu1  ;;  %923 = vperm.xlu1 (!%p1413_p12), %1678, %v849_v8   ;;  %883 = vperm.xlu0 (!%p1413_p12), %1677, %v841_v9   ;;  %v855_v25 = vld [vmem:[#allocation2] sm:$0xff] (!%p1413_p12)  ;;  %v993_v9 = vld [vmem:[%s1862_s18 + $0x18] sm:$0xff] (!%p1413_p12) }
 0x142   : > { %v1466_v36 = vpop.f32.mrb[11].mxu0  ;;  %v1490_v38 = vpop.f32.mrb[11].mxu1  ;;  %v1979_v26 = vld [vmem:[%s2089_s4] ss:$0 sm:$0xff] (!%p1413_p12) }
 0x143   : > { %v806_v39 = vadd.f32 %v1464_v31, %v465_v27  ;;  %v814_v40 = vadd.f32 %v1488_v32, %v473_v29  ;;  %v1467_v41 = vadd.f32 %v1466_v36, %v1465_v33  ;;  %v1491_v42 = vadd.f32 %v1490_v38, %v1489_v34  ;;  %1557 = vmatpush3.bf16.msra.mxu0 (!%p1413_p12), %v1554_v13  ;;  %v864_v31 = vld [vmem:[#allocation2 + $0x48] sm:$0xff] (!%p1413_p12)  ;;  %v863_v32 = vld [vmem:[#allocation2 + $0x40] sm:$0xff] (!%p1413_p12) }
 0x144   : > { %1577 = vmatpush3.bf16.msra.mxu1 (!%p1413_p12), %v1554_v13  ;;  %v990_v33 = vld [vmem:[%s1862_s18] sm:$0xff] (!%p1413_p12)  ;;  %v991_v34 = vld [vmem:[%s1862_s18 + $0x8] sm:$0xff] (!%p1413_p12) }
 0x145   : > { %823 = vst.msk [vmem:[#allocation2 + $0x20] sm:$0xff] %vm818_vm1, %v806_v39  ;;  %831 = vst.msk [vmem:[#allocation2 + $0x60] sm:$0xff] %vm818_vm1, %v814_v40  ;;  %v807_v43 = vadd.f32 %v1467_v41, %v466_v35  ;;  %v815_v44 = vadd.f32 %v1491_v42, %v474_v37  ;;  %928 = vperm.xlu1 (!%p1413_p12), %1678, %v850_v14   ;;  %888 = vperm.xlu0 (!%p1413_p12), %1677, %v842_v15   ;;  %v865_v41 = vld [vmem:[#allocation2 + $0x50] sm:$0xff] (!%p1413_p12)  ;;  %v1001_v14 = vld [vmem:[%s1862_s18 + $0x58] sm:$0xff] (!%p1413_p12) }
 0x147   : > { %824 = vst.msk [vmem:[#allocation2 + $0x28] sm:$0xff] %vm818_vm1, %v807_v43  ;;  %832 = vst.msk [vmem:[#allocation2 + $0x68] sm:$0xff] %vm818_vm1, %v815_v44  ;;  %v1468_v45 = vpop.f32.mrb[12].mxu0  ;;  %v1492_v46 = vpop.f32.mrb[12].mxu1  ;;  %v857_v44 = vld [vmem:[#allocation2 + $0x10] sm:$0xff] (!%p1413_p12) }
 0x148   : > { %v1469_v48 = vpop.f32.mrb[13].mxu0  ;;  %v1493_v50 = vpop.f32.mrb[13].mxu1 }
 0x149   : > { %v1470_v51 = vadd.f32 %v1469_v48, %v1468_v45  ;;  %v1494_v52 = vadd.f32 %v1493_v50, %v1492_v46  ;;  %v1471_v53 = vpop.f32.mrb[14].mxu0  ;;  %v1495_v54 = vpop.f32.mrb[14].mxu1  ;;  %838 = sbr.rel (%p1413_p12) target bundleno = 693 (0x2b5), region = 94  ;;  %933 = vperm.xlu1 (!%p1413_p12), %1678, %v851_v16   ;;  %893 = vperm.xlu0 (!%p1413_p12), %1677, %v843_v17   ;;  %v998_v45 = vld [vmem:[%s1862_s18 + $0x40] sm:$0xff] (!%p1413_p12)  ;;  %v999_v46 = vld [vmem:[%s1862_s18 + $0x48] sm:$0xff] (!%p1413_p12) }
 0x14a   : > { %v1472_v56 = vpop.f32.mrb[15].mxu0  ;;  %v1496_v58 = vpop.f32.mrb[15].mxu1 }
 0x14b   : > { %v808_v59 = vadd.f32 %v1470_v51, %v467_v47  ;;  %v816_v60 = vadd.f32 %v1494_v52, %v475_v49  ;;  %v1473_v61 = vadd.f32 %v1472_v56, %v1471_v53  ;;  %v1497_v62 = vadd.f32 %v1496_v58, %v1495_v54  ;;  %v858_v58 = vld [vmem:[#allocation2 + $0x18] sm:$0xff] (!%p1413_p12) }
 0x14c   : > { %v867_v7 = vld [vmem:[#allocation2 + $0x60] sm:$0xff] (!%p1413_p12) }
 0x14d   : > { %825 = vst.msk [vmem:[#allocation2 + $0x30] sm:$0xff] %vm818_vm1, %v808_v59  ;;  %833 = vst.msk [vmem:[#allocation2 + $0x70] sm:$0xff] %vm818_vm1, %v816_v60  ;;  %v809_v63 = vadd.f32 %v1473_v61, %v468_v55  ;;  %v817_v0 = vadd.f32 %v1497_v62, %v476_v57  ;;  %938 = vperm.xlu1 (!%p1413_p12), %1678, %v852_v18   ;;  %898 = vperm.xlu0 (!%p1413_p12), %1677, %v844_v19   ;;  %v866_v55 = vld [vmem:[#allocation2 + $0x58] sm:$0xff] (!%p1413_p12)  ;;  %v992_v59 = vld [vmem:[%s1862_s18 + $0x10] sm:$0xff] (!%p1413_p12) }
 0x14e   : > { %v1000_v60 = vld [vmem:[%s1862_s18 + $0x50] sm:$0xff] (!%p1413_p12)  ;;  %v859_v8 = vld [vmem:[#allocation2 + $0x20] sm:$0xff] (!%p1413_p12)  ;;  %v868_v19 = vld [vmem:[#allocation2 + $0x68] sm:$0xff] (!%p1413_p12) }
 0x14f   : > { %826 = vst.msk [vmem:[#allocation2 + $0x38] sm:$0xff] %vm818_vm1, %v809_v63  ;;  %834 = vst.msk [vmem:[#allocation2 + $0x78] sm:$0xff] %vm818_vm1, %v817_v0 }
 0x151   : > { %943 = vperm.xlu1 %1678, %v853_v20   ;;  %903 = vperm.xlu0 %1677, %v845_v21   ;;  %v860_v21 = vld [vmem:[#allocation2 + $0x28] sm:$0xff] }
 0x155   : > { %948 = vperm.xlu1 %1678, %v854_v22   ;;  %908 = vperm.xlu0 %1677, %v846_v23   ;;  %v994_v23 = vld [vmem:[%s1862_s18 + $0x20] sm:$0xff] }
 0x1b8   : > { %v879_v27 = vpop.permute.xlu1 %878  ;;  %v874_v28 = vpop.permute.xlu0 %873 }
 0x1b9   : > { %v952_v29 = vmul.f32 %v879_v27, %v856_v24  ;;  %v951_v30 = vmul.f32 %v874_v28, %v855_v25  ;;  %v1002_v24 = vld [vmem:[%s1862_s18 + $0x60] sm:$0xff] }
 0x1bb   : > { %v975_v35 = vadd.f32 %v1979_v26, %v952_v29  ;;  %v974_v36 = vadd.f32 %v1979_v26, %v951_v30 }
 0x1bc   : > { %v919_v37 = vpop.permute.xlu1 %918  ;;  %v914_v38 = vpop.permute.xlu0 %913 }
 0x1bd   : > { %v960_v39 = vmul.f32 %v919_v37, %v864_v31  ;;  %v959_v40 = vmul.f32 %v914_v38, %v863_v32  ;;  %v1006_v42 = vadd.f32 %v990_v33, %v974_v36  ;;  %v1007_v43 = vadd.f32 %v991_v34, %v975_v35  ;;  %v869_v36 = vld [vmem:[#allocation2 + $0x70] sm:$0xff]  ;;  %v995_v38 = vld [vmem:[%s1862_s18 + $0x28] sm:$0xff] }
 0x1be   : > { %v861_v37 = vld [vmem:[#allocation2 + $0x30] sm:$0xff] }
 0x1bf   : > { %v983_v47 = vadd.f32 %v1979_v26, %v960_v39  ;;  %v1022_v48 = vmax.f32 %v1006_v42, 0.0  ;;  %v1023_v49 = vmax.f32 %v1007_v43, 0.0  ;;  %v982_v50 = vadd.f32 %v1979_v26, %v959_v40  ;;  %v1003_v43 = vld [vmem:[%s1862_s18 + $0x68] sm:$0xff] }
 0x1c0   : > { %v924_v51 = vpop.permute.xlu1 %923  ;;  %v884_v52 = vpop.permute.xlu0 %883 }
 0x1c1   : > { %v961_v53 = vmul.f32 %v924_v51, %v865_v41  ;;  %v953_v54 = vmul.f32 %v884_v52, %v857_v44  ;;  %1526 = vmatprep.mubr.msk.f32.mxu0 %vm818_vm1, %v1022_v48  ;;  %v1014_v56 = vadd.f32 %v998_v45, %v982_v50  ;;  %v1015_v57 = vadd.f32 %v999_v46, %v983_v47  ;;  %v870_v48 = vld [vmem:[#allocation2 + $0x78] sm:$0xff]  ;;  %v996_v52 = vld [vmem:[%s1862_s18 + $0x30] sm:$0xff] }
 0x1c2   : > { %1527 = vmatmul.mubr.msk.f32.vlgmr.msra.gmra.mrb[0].mxu0 %vm818_vm1, %v1023_v49  ;;  %v862_v50 = vld [vmem:[#allocation2 + $0x38] sm:$0xff] }
 0x1c3   : > { %v984_v61 = vadd.f32 %v1979_v26, %v961_v53  ;;  %v976_v62 = vadd.f32 %v1979_v26, %v953_v54  ;;  %v1030_v63 = vmax.f32 %v1014_v56, 0.0  ;;  %v1031_v0 = vmax.f32 %v1015_v57, 0.0  ;;  %v1004_v53 = vld [vmem:[%s1862_s18 + $0x70] sm:$0xff] }
 0x1c4   : > { %v929_v1 = vpop.permute.xlu1 %928  ;;  %v889_v2 = vpop.permute.xlu0 %888 }
 0x1c5   : > { %v962_v3 = vmul.f32 %v929_v1, %v866_v55  ;;  %v954_v4 = vmul.f32 %v889_v2, %v858_v58  ;;  %1538 = vmatprep.mubr.msk.f32.mxu1 %vm818_vm1, %v1030_v63  ;;  %v1008_v5 = vadd.f32 %v992_v59, %v976_v62  ;;  %v1016_v6 = vadd.f32 %v1000_v60, %v984_v61  ;;  %v1005_v1 = vld [vmem:[%s1862_s18 + $0x78] sm:$0xff] }
 0x1c6   : > { %1539 = vmatmul.mubr.msk.f32.vlgmr.msra.gmra.mrb[0].mxu1 %vm818_vm1, %v1031_v0  ;;  %v997_v0 = vld [vmem:[%s1862_s18 + $0x38] sm:$0xff] }
 0x1c7   : > { %v985_v10 = vadd.f32 %v1979_v26, %v962_v3  ;;  %v977_v11 = vadd.f32 %v1979_v26, %v954_v4  ;;  %v1024_v12 = vmax.f32 %v1008_v5, 0.0  ;;  %v1032_v13 = vmax.f32 %v1016_v6, 0.0 }
 0x1c8   : > { %v934_v15 = vpop.permute.xlu1 %933  ;;  %v894_v16 = vpop.permute.xlu0 %893 }
 0x1c9   : > { %v963_v17 = vmul.f32 %v934_v15, %v867_v7  ;;  %v955_v18 = vmul.f32 %v894_v16, %v859_v8  ;;  %1529 = vmatprep.mubr.msk.f32.mxu0 %vm818_vm1, %v1024_v12  ;;  %1541 = vmatprep.mubr.msk.f32.mxu1 %vm818_vm1, %v1032_v13  ;;  %v1009_v20 = vadd.f32 %v993_v9, %v977_v11 }
 0x1ca   : > { %v1017_v22 = vadd.f32 %v1001_v14, %v985_v10 }
 0x1cb   : > { %v986_v25 = vadd.f32 %v1979_v26, %v963_v17  ;;  %v978_v27 = vadd.f32 %v1979_v26, %v955_v18  ;;  %v1025_v28 = vmax.f32 %v1009_v20, 0.0 }
 0x1cc   : > { %v939_v29 = vpop.permute.xlu1 %938  ;;  %v899_v30 = vpop.permute.xlu0 %898  ;;  %v1033_v31 = vmax.f32 %v1017_v22, 0.0 }
 0x1cd   : > { %v964_v32 = vmul.f32 %v939_v29, %v868_v19  ;;  %v956_v33 = vmul.f32 %v899_v30, %v860_v21  ;;  %1530 = vmatmul.mubr.msk.f32.gmra.mrb[2].mxu0 %vm818_vm1, %v1025_v28  ;;  %v1010_v34 = vadd.f32 %v994_v23, %v978_v27  ;;  %v1018_v35 = vadd.f32 %v1002_v24, %v986_v25 }
 0x1ce   : > { %1542 = vmatmul.mubr.msk.f32.gmra.mrb[2].mxu1 %vm818_vm1, %v1033_v31 }
 0x1cf   : > { %v987_v39 = vadd.f32 %v1979_v26, %v964_v32  ;;  %v979_v40 = vadd.f32 %v1979_v26, %v956_v33  ;;  %v1026_v41 = vmax.f32 %v1010_v34, 0.0  ;;  %v1034_v42 = vmax.f32 %v1018_v35, 0.0 }
 0x1d0   : > { %v944_v44 = vpop.permute.xlu1 %943  ;;  %v904_v45 = vpop.permute.xlu0 %903 }
 0x1d1   : > { %v965_v46 = vmul.f32 %v944_v44, %v869_v36  ;;  %v957_v47 = vmul.f32 %v904_v45, %v861_v37  ;;  %1532 = vmatprep.mubr.msk.f32.mxu0 %vm818_vm1, %v1026_v41  ;;  %1544 = vmatprep.mubr.msk.f32.mxu1 %vm818_vm1, %v1034_v42  ;;  %v1011_v49 = vadd.f32 %v995_v38, %v979_v40 }
 0x1d2   : > { %v1019_v51 = vadd.f32 %v1003_v43, %v987_v39 }
 0x1d3   : > { %v988_v54 = vadd.f32 %v1979_v26, %v965_v46  ;;  %v980_v55 = vadd.f32 %v1979_v26, %v957_v47  ;;  %v1027_v56 = vmax.f32 %v1011_v49, 0.0 }
 0x1d4   : > { %v949_v57 = vpop.permute.xlu1 %948  ;;  %v909_v58 = vpop.permute.xlu0 %908  ;;  %v1035_v59 = vmax.f32 %v1019_v51, 0.0 }
 0x1d5   : > { %v966_v60 = vmul.f32 %v949_v57, %v870_v48  ;;  %v958_v61 = vmul.f32 %v909_v58, %v862_v50  ;;  %1533 = vmatmul.mubr.msk.f32.gmra.mrb[4].mxu0 %vm818_vm1, %v1027_v56  ;;  %v1012_v62 = vadd.f32 %v996_v52, %v980_v55  ;;  %v1020_v63 = vadd.f32 %v1004_v53, %v988_v54 }
 0x1d6   : > { %1545 = vmatmul.mubr.msk.f32.gmra.mrb[4].mxu1 %vm818_vm1, %v1035_v59 }
 0x1d7   : > { %v989_v2 = vadd.f32 %v1979_v26, %v966_v60  ;;  %v981_v3 = vadd.f32 %v1979_v26, %v958_v61  ;;  %v1028_v4 = vmax.f32 %v1012_v62, 0.0  ;;  %v1036_v5 = vmax.f32 %v1020_v63, 0.0  ;;  %v1415_v26 = vld [vmem:[%s2091_s6] ss:$0 sm:$0xff] }
 0x1d9   : > { %1535 = vmatprep.mubr.msk.f32.mxu0 %vm818_vm1, %v1028_v4  ;;  %1547 = vmatprep.mubr.msk.f32.mxu1 %vm818_vm1, %v1036_v5  ;;  %v1013_v6 = vadd.f32 %v997_v0, %v981_v3  ;;  %v1021_v7 = vadd.f32 %v1005_v1, %v989_v2 }
 0x1db   : > { %v1029_v8 = vmax.f32 %v1013_v6, 0.0  ;;  %v1037_v9 = vmax.f32 %v1021_v7, 0.0 }
 0x1dd   : > { %1536 = vmatmul.mubr.msk.f32.gmra.mrb[6].mxu0 %vm818_vm1, %v1029_v8  ;;  %1548 = vmatmul.mubr.msk.f32.gmra.mrb[6].mxu1 %vm818_vm1, %v1037_v9 }
 0x295   : > { %v1528_v10 = vpop.f32.mrb[0].mxu0 }
 0x296   : > { %v1169_v11 = vadd.f32 %v1528_v10, %v1415_v26  ;;  %v1163_v12 = vpop.f32.mrb[1].mxu0 }
 0x297   : > { %v1164_v13 = vadd.f32 %v1415_v26, %v1163_v12 }
 0x298   : > { %1243 = vst.msk [vmem:[%s1872_s10 + $0x8] sm:$0xff] %vm818_vm1, %v1169_v11 }
 0x299   : > { %1242 = vst.msk [vmem:[%s1872_s10] sm:$0xff] %vm818_vm1, %v1164_v13  ;;  %v1540_v14 = vpop.f32.mrb[0].mxu1 }
 0x29a   : > { %v1209_v15 = vadd.f32 %v1540_v14, %v1415_v26  ;;  %v1203_v16 = vpop.f32.mrb[1].mxu1 }
 0x29b   : > { %v1204_v17 = vadd.f32 %v1415_v26, %v1203_v16 }
 0x29c   : > { %1251 = vst.msk [vmem:[%s1872_s10 + $0x48] sm:$0xff] %vm818_vm1, %v1209_v15 }
 0x29d   : > { %1250 = vst.msk [vmem:[%s1872_s10 + $0x40] sm:$0xff] %vm818_vm1, %v1204_v17 }
 0x2a0   : > { %v1531_v18 = vpop.f32.mrb[2].mxu0 }
 0x2a1   : > { %v1179_v19 = vadd.f32 %v1531_v18, %v1415_v26  ;;  %v1543_v20 = vpop.f32.mrb[2].mxu1  ;;  %v1173_v21 = vpop.f32.mrb[3].mxu0 }
 0x2a2   : > { %v1219_v22 = vadd.f32 %v1543_v20, %v1415_v26  ;;  %v1174_v23 = vadd.f32 %v1415_v26, %v1173_v21  ;;  %v1213_v24 = vpop.f32.mrb[3].mxu1 }
 0x2a3   : > { %1245 = vst.msk [vmem:[%s1872_s10 + $0x18] sm:$0xff] %vm818_vm1, %v1179_v19  ;;  %v1214_v25 = vadd.f32 %v1415_v26, %v1213_v24 }
 0x2a4   : > { %1253 = vst.msk [vmem:[%s1872_s10 + $0x58] sm:$0xff] %vm818_vm1, %v1219_v22  ;;  %1244 = vst.msk [vmem:[%s1872_s10 + $0x10] sm:$0xff] %vm818_vm1, %v1174_v23 }
 0x2a5   : > { %1252 = vst.msk [vmem:[%s1872_s10 + $0x50] sm:$0xff] %vm818_vm1, %v1214_v25 }
 0x2a8   : > { %v1534_v27 = vpop.f32.mrb[4].mxu0 }
 0x2a9   : > { %v1189_v28 = vadd.f32 %v1534_v27, %v1415_v26  ;;  %v1546_v29 = vpop.f32.mrb[4].mxu1  ;;  %v1183_v30 = vpop.f32.mrb[5].mxu0 }
 0x2aa   : > { %v1229_v31 = vadd.f32 %v1546_v29, %v1415_v26  ;;  %v1184_v32 = vadd.f32 %v1415_v26, %v1183_v30  ;;  %v1223_v33 = vpop.f32.mrb[5].mxu1 }
 0x2ab   : > { %1247 = vst.msk [vmem:[%s1872_s10 + $0x28] sm:$0xff] %vm818_vm1, %v1189_v28  ;;  %v1224_v34 = vadd.f32 %v1415_v26, %v1223_v33 }
 0x2ac   : > { %1255 = vst.msk [vmem:[%s1872_s10 + $0x68] sm:$0xff] %vm818_vm1, %v1229_v31  ;;  %1246 = vst.msk [vmem:[%s1872_s10 + $0x20] sm:$0xff] %vm818_vm1, %v1184_v32 }
 0x2ad   : > { %1254 = vst.msk [vmem:[%s1872_s10 + $0x60] sm:$0xff] %vm818_vm1, %v1224_v34 }
 0x2b0   : > { %v1537_v35 = vpop.f32.mrb[6].mxu0  ;;  %v1549_v36 = vpop.f32.mrb[6].mxu1 }
 0x2b1   : > { %v1199_v37 = vadd.f32 %v1537_v35, %v1415_v26  ;;  %v1239_v38 = vadd.f32 %v1549_v36, %v1415_v26  ;;  %v1193_v39 = vpop.f32.mrb[7].mxu0  ;;  %v1233_v40 = vpop.f32.mrb[7].mxu1 }
 0x2b2   : > { %v1194_v41 = vadd.f32 %v1415_v26, %v1193_v39  ;;  %v1234_v42 = vadd.f32 %v1415_v26, %v1233_v40 }
 0x2b3   : > { %1249 = vst.msk [vmem:[%s1872_s10 + $0x38] sm:$0xff] %vm818_vm1, %v1199_v37  ;;  %1257 = vst.msk [vmem:[%s1872_s10 + $0x78] sm:$0xff] %vm818_vm1, %v1239_v38 }
 0x2b4   : > { %1248 = vst.msk [vmem:[%s1872_s10 + $0x30] sm:$0xff] %vm818_vm1, %v1194_v41  ;;  %1256 = vst.msk [vmem:[%s1872_s10 + $0x70] sm:$0xff] %vm818_vm1, %v1234_v42 }
 0x2b5 PF: > { %s17_s30 = sadd.s32 1, %s1733_s30   ;;  %s2093_s24 = smov %s1713_s25 }
 0x2b6   : > { %p14_p13 = scmp.ge.s32.totalorder %s17_s30, 20   ;;  %s2094_s25 = smov %s1828_s14 }
 0x2b7   : > { %s2095_s26 = smov %s1725_s28  ;;  %s2096_s27 = smov %s1729_s29 }
 0x2b8   : > { %s2097_s28 = smov %s2100_s8  ;;  %s2098_s29 = smov %s2104_s9 }
 0x2b9   :  { %16 = sbr.rel (!%p14_p13) target bundleno = 4 (0x4), region = 136 }

</bundles_post_ra>
